<compile_context>
chip_gen: v7x
topology: tpu7x:2x2x1
jax: 0.10.0
libtpu: 0.0.40
codegen_flags: <defaults>
</compile_context>

<pallas_src>
import functools
import math

import jax
import jax.numpy as jnp
from jax.experimental import pallas as pl
from jax.experimental.pallas import tpu as pltpu


def _enc_lstm2_kernel(emb_ref, wih0_ref, wrec_ref, wih1_ref, b0_ref, b1_ref,
                      out_ref, hN_ref, cN_ref,
                      gx_sc, st_sc, *, seq_len, needs_mask):
    """Fused 2-layer LSTM; one grid step = one chunk of T time steps."""
    chunk = pl.program_id(0)
    last = pl.num_programs(0) - 1
    T, B, H = out_ref.shape
    G = 4 * H

    @pl.when(chunk == 0)
    def _():
        st_sc[...] = jnp.zeros_like(st_sc)      # packed [h0 | h1 | c0 | c1]

    # ---- Hoisted per-chunk work (off the serial critical path) -------------
    # Layer-0 input projection for all T steps at once (one MXU-friendly
    # matmul), bias folded in.  Result lives in VMEM scratch.
    gx_sc[...] = (jnp.dot(emb_ref[...], wih0_ref[...],
                          preferred_element_type=jnp.float32)
                  + jnp.broadcast_to(b0_ref[...], (T * B, G)))

    # Resident parameter tiles: load once per chunk, reused by every step.
    w_rec = wrec_ref[...]                                 # (2H, 8H) bf16 block-diag
    wih1 = wih1_ref[...]                                  # (H, 4H)  bf16
    b1 = jnp.broadcast_to(b1_ref[...], (B, G))            # hoisted out of loop

    st = st_sc[...]
    hh0 = st[:, :2 * H]                                   # [h0 | h1]
    cc0 = st[:, 2 * H:]                                   # [c0 | c1]

    def gate_math(gates, c_prev):
        # Gate order was permuted to [i, f, o, g] in the wrapper:
        # one wide sigmoid + one tanh per layer.
        s = jax.nn.sigmoid(gates[:, :3 * H])
        g = jnp.tanh(gates[:, 3 * H:])
        i = s[:, :H]
        f = s[:, H:2 * H]
        o = s[:, 2 * H:]
        c_new = f * c_prev + i * g
        h_new = o * jnp.tanh(c_new)
        return h_new, c_new

    def step(t, carry):
        hh, cc = carry
        row = pl.multiple_of(t * B, B)

        # Single merged recurrent matmul for BOTH layers' previous states.
        g_rec = jnp.dot(hh.astype(jnp.bfloat16), w_rec,
                        preferred_element_type=jnp.float32)        # (B, 8H)

        # Layer 0: precomputed input projection + recurrent part.
        g0 = gx_sc[pl.ds(row, B), :] + g_rec[:, :G]
        h0n, c0n = gate_math(g0, cc[:, :H])

        # TODO(synk): inter-layer dropout (training mode) omitted — identity in eval.
        # Layer 1: only this matmul depends on the fresh h0 (dependent push).
        g1 = (jnp.dot(h0n.astype(jnp.bfloat16), wih1,
                      preferred_element_type=jnp.float32)
              + g_rec[:, G:] + b1)
        h1n, c1n = gate_math(g1, cc[:, H:])

        out_ref[t] = h1n

        hh_n = jnp.concatenate([h0n, h1n], axis=1)
        cc_n = jnp.concatenate([c0n, c1n], axis=1)
        if needs_mask:
            # Padded tail steps must not update the carried state.
            valid = (chunk * T + t) < seq_len
            hh_n = jnp.where(valid, hh_n, hh)
            cc_n = jnp.where(valid, cc_n, cc)
        return hh_n, cc_n

    hh, cc = jax.lax.fori_loop(0, T, step, (hh0, cc0), unroll=min(T, 8))

    # Carry packed state across chunks (one lane-dense store).
    st_sc[...] = jnp.concatenate([hh, cc], axis=1)

    # Final per-layer (h, c): written once, on the last chunk only.
    @pl.when(chunk == last)
    def _():
        hN_ref[0] = hh[:, :H]
        hN_ref[1] = hh[:, H:]
        cN_ref[0] = cc[:, :H]
        cN_ref[1] = cc[:, H:]


def _reorder_gates(x):
    """Permute PyTorch gate blocks [i, f, g, o] -> [i, f, o, g] along axis 0."""
    i, f, g, o = jnp.split(x, 4, axis=0)
    return jnp.concatenate([i, f, o, g], axis=0)


def encoder_lstm2(embedded, layer0, layer1, *, t_chunk=8):
    """embedded: (S, B, E) f32. Returns (outputs (S,B,H), h_n (2,B,H), c_n (2,B,H))."""
    S, B, E = embedded.shape
    H = layer0["w_hh"].shape[1]
    G = 4 * H

    # --- chunk selection: pad S up to a multiple of t_chunk, mask the tail ---
    t_chunk = max(1, min(t_chunk, S))
    if S > t_chunk:
        # keep the (sublane) leading dim of the embedded block 8-aligned
        while (t_chunk * B) % 8 != 0 and t_chunk < S:
            t_chunk += 1
    s_pad = ((S + t_chunk - 1) // t_chunk) * t_chunk
    n_chunks = s_pad // t_chunk
    needs_mask = (s_pad != S)

    # --- parameter prep (gate reorder, transpose, bf16 for the MXU) ---------
    wih0_t = _reorder_gates(layer0["w_ih"]).T.astype(jnp.bfloat16)   # (E, 4H)
    whh0_t = _reorder_gates(layer0["w_hh"]).T.astype(jnp.bfloat16)   # (H, 4H)
    wih1_t = _reorder_gates(layer1["w_ih"]).T.astype(jnp.bfloat16)   # (H, 4H)
    whh1_t = _reorder_gates(layer1["w_hh"]).T.astype(jnp.bfloat16)   # (H, 4H)
    b0 = _reorder_gates(layer0["b_ih"] + layer0["b_hh"]).reshape(1, G).astype(jnp.float32)
    b1 = _reorder_gates(layer1["b_ih"] + layer1["b_hh"]).reshape(1, G).astype(jnp.float32)

    # Block-diagonal stacked recurrent weight: [h0|h1] @ w_rec gives both
    # layers' recurrent gate contributions in a single MXU push.
    zeros = jnp.zeros((H, G), jnp.bfloat16)
    w_rec = jnp.concatenate(
        [jnp.concatenate([whh0_t, zeros], axis=1),
         jnp.concatenate([zeros, whh1_t], axis=1)], axis=0)           # (2H, 8H)

    # Stream embedded activations (bf16, flattened to 2D) instead of gx0 f32:
    # E*2 bytes/token over HBM instead of 4H*4 bytes/token.
    emb = embedded.astype(jnp.bfloat16)
    if needs_mask:
        emb = jnp.pad(emb, ((0, s_pad - S), (0, 0), (0, 0)))
    emb2d = emb.reshape(s_pad * B, E)

    # --- VMEM budget (derived, generation-agnostic; stays << 64 MiB) --------
    bytes_in = 2 * (t_chunk * B * E * 2)                 # emb chunk, double-buffered
    bytes_out = 2 * (t_chunk * B * H * 4 + 2 * 2 * B * H * 4)
    bytes_w = 2 * ((w_rec.size + wih0_t.size + wih1_t.size) * 2 + (b0.size + b1.size) * 4)
    bytes_scr = (t_chunk * B * G + B * 4 * H) * 4
    vmem_limit = int(min(64 * 1024 * 1024,
                         max(16 * 1024 * 1024,
                             4 * (bytes_in + bytes_out + bytes_w + bytes_scr))))

    grid_spec = pltpu.PrefetchScalarGridSpec(
        num_scalar_prefetch=0,
        grid=(n_chunks,),
        in_specs=[
            pl.BlockSpec((t_chunk * B, E), lambda c: (c, 0)),   # embedded chunk (bf16)
            pl.BlockSpec((E, G), lambda c: (0, 0)),             # W_ih0^T  (resident)
            pl.BlockSpec((2 * H, 2 * G), lambda c: (0, 0)),     # stacked W_hh (resident)
            pl.BlockSpec((H, G), lambda c: (0, 0)),             # W_ih1^T  (resident)
            pl.BlockSpec((1, G), lambda c: (0, 0)),             # bias layer 0
            pl.BlockSpec((1, G), lambda c: (0, 0)),             # bias layer 1
        ],
        out_specs=[
            pl.BlockSpec((t_chunk, B, H), lambda c: (c, 0, 0)),  # top outputs / chunk
            pl.BlockSpec((2, B, H), lambda c: (0, 0, 0)),        # final h (2 layers)
            pl.BlockSpec((2, B, H), lambda c: (0, 0, 0)),        # final c (2 layers)
        ],
        scratch_shapes=[
            pltpu.VMEM((t_chunk * B, G), jnp.float32),   # hoisted layer-0 gates
            pltpu.VMEM((B, 4 * H), jnp.float32),         # packed carry [h0|h1|c0|c1]
        ],
    )

    kernel = functools.partial(_enc_lstm2_kernel,
                               seq_len=S, needs_mask=needs_mask)

    outputs, hidden, cell = pl.pallas_call(
        kernel,
        out_shape=(
            jax.ShapeDtypeStruct((s_pad, B, H), jnp.float32),
            jax.ShapeDtypeStruct((2, B, H), jnp.float32),
            jax.ShapeDtypeStruct((2, B, H), jnp.float32),
        ),
        grid_spec=grid_spec,
        compiler_params=pltpu.CompilerParams(
            dimension_semantics=("arbitrary",),   # time recurrence is sequential
            vmem_limit_bytes=vmem_limit,
        ),
    )(emb2d, wih0_t, w_rec, wih1_t, b0, b1)

    if needs_mask:
        outputs = outputs[:S]
    return outputs, hidden, cell


def init_encoder_params(key, input_dim, emb_dim, hidden_dim, n_layers):
    """Deterministic synthetic parameters with PyTorch-like shapes/init."""
    keys = jax.random.split(key, 1 + 4 * n_layers)
    params = {
        "embedding": jax.random.normal(keys[0], (input_dim, emb_dim),
                                       jnp.float32) * 0.1,
        "lstm": [],
    }
    bound = 1.0 / math.sqrt(hidden_dim)
    for layer in range(n_layers):
        in_dim = emb_dim if layer == 0 else hidden_dim
        k = keys[1 + 4 * layer: 1 + 4 * (layer + 1)]
        params["lstm"].append({
            "w_ih": jax.random.uniform(k[0], (4 * hidden_dim, in_dim),
                                       jnp.float32, -bound, bound),
            "w_hh": jax.random.uniform(k[1], (4 * hidden_dim, hidden_dim),
                                       jnp.float32, -bound, bound),
            "b_ih": jax.random.uniform(k[2], (4 * hidden_dim,),
                                       jnp.float32, -bound, bound),
            "b_hh": jax.random.uniform(k[3], (4 * hidden_dim,),
                                       jnp.float32, -bound, bound),
        })
    return params


def encoder_forward(params, src, *, t_chunk=8):
    """src: (S, B) int32.  Returns (outputs, hidden, cell) like Encoder.forward."""
    # Embedding lookup (glue in XLA) + eval-mode dropout (identity).
    embedded = jnp.take(params["embedding"], src, axis=0)    # (S, B, E)
    # TODO(synk): embedding dropout (training mode) omitted — identity in eval mode.
    # TODO(synk): fusing the embedding gather into the kernel via scalar-prefetched
    #             token ids not implemented; gather stays in XLA.
    assert len(params["lstm"]) == 2, "fused kernel implements the spec's 2-layer LSTM"
    return encoder_lstm2(embedded, params["lstm"][0], params["lstm"][1],
                         t_chunk=t_chunk)


def _reference_forward(params, src):
    """Pure-JAX f32 reference (PyTorch LSTM semantics, eval-mode dropout)."""
    embedded = jnp.take(params["embedding"], src, axis=0)
    S, B, _ = embedded.shape
    H = params["lstm"][0]["w_hh"].shape[1]

    def cell(x, h, c, p):
        g = (x @ p["w_ih"].T + p["b_ih"] + h @ p["w_hh"].T + p["b_hh"])
        i = jax.nn.sigmoid(g[:, 0 * H:1 * H])
        f = jax.nn.sigmoid(g[:, 1 * H:2 * H])
        gg = jnp.tanh(g[:, 2 * H:3 * H])
        o = jax.nn.sigmoid(g[:, 3 * H:4 * H])
        c = f * c + i * gg
        return o * jnp.tanh(c), c

    h = [jnp.zeros((B, H), jnp.float32) for _ in range(2)]
    c = [jnp.zeros((B, H), jnp.float32) for _ in range(2)]
    outs = []
    for t in range(S):
        h0, c0 = cell(embedded[t], h[0], c[0], params["lstm"][0])
        h1, c1 = cell(h0, h[1], c[1], params["lstm"][1])
        h, c = [h0, h1], [c0, c1]
        outs.append(h1)
    return jnp.stack(outs), jnp.stack(h), jnp.stack(c)


if __name__ == "__main__":
    INPUT_DIM = 50      # vocab size
    EMB_DIM = 16
    HIDDEN_DIM = 32
    N_LAYERS = 2
    SEQ_LEN = 8
    BATCH = 2

    root = jax.random.PRNGKey(0)
    k_params, k_src = jax.random.split(root)

    params = init_encoder_params(k_params, INPUT_DIM, EMB_DIM,
                                 HIDDEN_DIM, N_LAYERS)
    src = jax.random.randint(k_src, (SEQ_LEN, BATCH), 0, INPUT_DIM,
                             dtype=jnp.int32)

    outputs, hidden, cell = encoder_forward(params, src)
    jax.block_until_ready((outputs, hidden, cell))

    assert outputs.shape == (SEQ_LEN, BATCH, HIDDEN_DIM)
    assert hidden.shape == (N_LAYERS, BATCH, HIDDEN_DIM)
    assert cell.shape == (N_LAYERS, BATCH, HIDDEN_DIM)
    assert bool(jnp.all(jnp.isfinite(outputs)))

    # Numerical check against an f32 pure-JAX reference (bf16 MXU tolerance).
    ref_out, ref_h, ref_c = _reference_forward(params, src)
    err = max(float(jnp.max(jnp.abs(outputs - ref_out))),
              float(jnp.max(jnp.abs(hidden - ref_h))),
              float(jnp.max(jnp.abs(cell - ref_c))))
    assert err < 3e-2, f"max abs error vs reference too large: {err}"

    print("KERNEL_OK")
</pallas_src>

<mosaic_0001>
module attributes {stable_mosaic.version = 11 : i64} {
  func.func @_enc_lstm2_kernel(%arg0: i32, %arg1: memref<16x16xbf16, #tpu.memory_space<vmem>>, %arg2: memref<16x128xbf16, #tpu.memory_space<vmem>>, %arg3: memref<64x256xbf16, #tpu.memory_space<vmem>>, %arg4: memref<32x128xbf16, #tpu.memory_space<vmem>>, %arg5: memref<1x128xf32, #tpu.memory_space<vmem>>, %arg6: memref<1x128xf32, #tpu.memory_space<vmem>>, %arg7: memref<8x2x32xf32, #tpu.memory_space<vmem>>, %arg8: memref<2x2x32xf32, #tpu.memory_space<vmem>>, %arg9: memref<2x2x32xf32, #tpu.memory_space<vmem>>, %arg10: memref<16x128xf32, #tpu.memory_space<vmem>>, %arg11: memref<2x128xf32, #tpu.memory_space<vmem>>) attributes {dimension_semantics = [#tpu.dimension_semantics<arbitrary>], iteration_bounds = array<i64: 1>, scalar_prefetch = 0 : i64, scratch_operands = 2 : i64, tpu.core_type = #tpu.core_type<tc>, window_params = [{transform_indices = @transform_0, window_bounds = array<i64: 16, 16>}, {pipeline_mode = #tpu.pipeline_mode<synchronous>, transform_indices = @transform_1, window_bounds = array<i64: 16, 128>}, {pipeline_mode = #tpu.pipeline_mode<synchronous>, transform_indices = @transform_2, window_bounds = array<i64: 64, 256>}, {pipeline_mode = #tpu.pipeline_mode<synchronous>, transform_indices = @transform_3, window_bounds = array<i64: 32, 128>}, {pipeline_mode = #tpu.pipeline_mode<synchronous>, transform_indices = @transform_4, window_bounds = array<i64: 1, 128>}, {pipeline_mode = #tpu.pipeline_mode<synchronous>, transform_indices = @transform_5, window_bounds = array<i64: 1, 128>}, {transform_indices = @transform_6, window_bounds = array<i64: 8, 2, 32>}, {pipeline_mode = #tpu.pipeline_mode<synchronous>, transform_indices = @transform_7, window_bounds = array<i64: 2, 2, 32>}, {pipeline_mode = #tpu.pipeline_mode<synchronous>, transform_indices = @transform_8, window_bounds = array<i64: 2, 2, 32>}]} {
    %c0_i32 = arith.constant 0 : i32
    %0 = arith.cmpi eq, %arg0, %c0_i32 : i32
    %1 = arith.extui %0 : i1 to i32
    %c0_i32_0 = arith.constant 0 : i32
    %2 = arith.cmpi ne, %1, %c0_i32_0 : i32
    scf.if %2 {
      %cst_85 = arith.constant 0.000000e+00 : f32
      %448 = vector.broadcast %cst_85 : f32 to vector<2x128xf32>
      %c0_86 = arith.constant 0 : index
      %c0_87 = arith.constant 0 : index
      %449 = vector.load %arg11[%c0_86, %c0_87] : memref<2x128xf32, #tpu.memory_space<vmem>>, vector<2x128xf32>
      tpu.vector_store %arg11[%c0_86, %c0_87], %448 {strides = array<i32>} : memref<2x128xf32, #tpu.memory_space<vmem>>, vector<2x128xf32>,
    } else {
    }
    %c0 = arith.constant 0 : index
    %c0_1 = arith.constant 0 : index
    %3 = vector.load %arg1[%c0, %c0_1] : memref<16x16xbf16, #tpu.memory_space<vmem>>, vector<16x16xbf16>
    %c0_2 = arith.constant 0 : index
    %c0_3 = arith.constant 0 : index
    %4 = vector.load %arg2[%c0_2, %c0_3] : memref<16x128xbf16, #tpu.memory_space<vmem>>, vector<16x128xbf16>
    %cst = arith.constant dense<0.000000e+00> : vector<16x128xf32>
    %5 = tpu.matmul %3, %4, %cst {dimension_numbers = #tpu.dot_dimension_numbers<[1], [0], [0], [1], [0, 0, 1, 1], [], []>} : vector<16x16xbf16>, vector<16x128xbf16>, vector<16x128xf32> -> vector<16x128xf32>
    %c0_4 = arith.constant 0 : index
    %c0_5 = arith.constant 0 : index
    %6 = vector.load %arg5[%c0_4, %c0_5] : memref<1x128xf32, #tpu.memory_space<vmem>>, vector<1x128xf32>
    %7 = vector.shape_cast %6 : vector<1x128xf32> to vector<1x128xf32>
    %8 = vector.broadcast %7 : vector<1x128xf32> to vector<16x128xf32>
    %9 = arith.addf %5, %8 : vector<16x128xf32>
    %c0_6 = arith.constant 0 : index
    %c0_7 = arith.constant 0 : index
    %10 = vector.load %arg10[%c0_6, %c0_7] : memref<16x128xf32, #tpu.memory_space<vmem>>, vector<16x128xf32>
    tpu.vector_store %arg10[%c0_6, %c0_7], %9 {strides = array<i32>} : memref<16x128xf32, #tpu.memory_space<vmem>>, vector<16x128xf32>,
    %c0_8 = arith.constant 0 : index
    %c0_9 = arith.constant 0 : index
    %11 = vector.load %arg3[%c0_8, %c0_9] : memref<64x256xbf16, #tpu.memory_space<vmem>>, vector<64x256xbf16>
    %c0_10 = arith.constant 0 : index
    %c0_11 = arith.constant 0 : index
    %12 = vector.load %arg4[%c0_10, %c0_11] : memref<32x128xbf16, #tpu.memory_space<vmem>>, vector<32x128xbf16>
    %c0_12 = arith.constant 0 : index
    %c0_13 = arith.constant 0 : index
    %13 = vector.load %arg6[%c0_12, %c0_13] : memref<1x128xf32, #tpu.memory_space<vmem>>, vector<1x128xf32>
    %14 = vector.shape_cast %13 : vector<1x128xf32> to vector<1x128xf32>
    %15 = vector.broadcast %14 : vector<1x128xf32> to vector<2x128xf32>
    %c0_14 = arith.constant 0 : index
    %c0_15 = arith.constant 0 : index
    %16 = vector.load %arg11[%c0_14, %c0_15] : memref<2x128xf32, #tpu.memory_space<vmem>>, vector<2x128xf32>
    %17 = vector.extract_strided_slice %16 {offsets = [0, 0], sizes = [2, 64], strides = [1, 1]} : vector<2x128xf32> to vector<2x64xf32>
    %18 = vector.extract_strided_slice %16 {offsets = [0, 64], sizes = [2, 64], strides = [1, 1]} : vector<2x128xf32> to vector<2x64xf32>
    %c0_i32_16 = arith.constant 0 : i32
    %c2_i32 = arith.constant 2 : i32
    %19 = arith.muli %c0_i32_16, %c2_i32 : i32
    %20 = tpu.assume_multiple %19, 2 : i32
    %21 = arith.truncf %17 : vector<2x64xf32> to vector<2x64xbf16>
    %cst_17 = arith.constant dense<0.000000e+00> : vector<2x256xf32>
    %22 = tpu.matmul %21, %11, %cst_17 {dimension_numbers = #tpu.dot_dimension_numbers<[1], [0], [0], [1], [0, 0, 1, 1], [], []>} : vector<2x64xbf16>, vector<64x256xbf16>, vector<2x256xf32> -> vector<2x256xf32>
    %23 = arith.index_cast %20 : i32 to index
    %c0_18 = arith.constant 0 : index
    %24 = vector.load %arg10[%23, %c0_18] : memref<16x128xf32, #tpu.memory_space<vmem>>, vector<2x128xf32>
    %25 = vector.extract_strided_slice %22 {offsets = [0, 0], sizes = [2, 128], strides = [1, 1]} : vector<2x256xf32> to vector<2x128xf32>
    %26 = arith.addf %24, %25 : vector<2x128xf32>
    %27 = vector.extract_strided_slice %18 {offsets = [0, 0], sizes = [2, 32], strides = [1, 1]} : vector<2x64xf32> to vector<2x32xf32>
    %28 = vector.extract_strided_slice %26 {offsets = [0, 0], sizes = [2, 96], strides = [1, 1]} : vector<2x128xf32> to vector<2x96xf32>
    %29 = arith.negf %28 : vector<2x96xf32>
    %30 = math.exp %29 : vector<2x96xf32>
    %cst_19 = arith.constant 1.000000e+00 : f32
    %31 = vector.broadcast %cst_19 : f32 to vector<2x96xf32>
    %32 = arith.addf %31, %30 : vector<2x96xf32>
    %33 = arith.divf %31, %32 : vector<2x96xf32>
    %34 = vector.extract_strided_slice %26 {offsets = [0, 96], sizes = [2, 32], strides = [1, 1]} : vector<2x128xf32> to vector<2x32xf32>
    %35 = math.tanh %34 : vector<2x32xf32>
    %36 = vector.extract_strided_slice %33 {offsets = [0, 0], sizes = [2, 32], strides = [1, 1]} : vector<2x96xf32> to vector<2x32xf32>
    %37 = vector.extract_strided_slice %33 {offsets = [0, 32], sizes = [2, 32], strides = [1, 1]} : vector<2x96xf32> to vector<2x32xf32>
    %38 = vector.extract_strided_slice %33 {offsets = [0, 64], sizes = [2, 32], strides = [1, 1]} : vector<2x96xf32> to vector<2x32xf32>
    %39 = arith.mulf %37, %27 : vector<2x32xf32>
    %40 = arith.mulf %36, %35 : vector<2x32xf32>
    %41 = arith.addf %39, %40 : vector<2x32xf32>
    %42 = math.tanh %41 : vector<2x32xf32>
    %43 = arith.mulf %38, %42 : vector<2x32xf32>
    %44 = arith.truncf %43 : vector<2x32xf32> to vector<2x32xbf16>
    %cst_20 = arith.constant dense<0.000000e+00> : vector<2x128xf32>
    %45 = tpu.matmul %44, %12, %cst_20 {dimension_numbers = #tpu.dot_dimension_numbers<[1], [0], [0], [1], [0, 0, 1, 1], [], []>} : vector<2x32xbf16>, vector<32x128xbf16>, vector<2x128xf32> -> vector<2x128xf32>
    %46 = vector.extract_strided_slice %22 {offsets = [0, 128], sizes = [2, 128], strides = [1, 1]} : vector<2x256xf32> to vector<2x128xf32>
    %47 = arith.addf %45, %46 : vector<2x128xf32>
    %48 = arith.addf %47, %15 : vector<2x128xf32>
    %49 = vector.extract_strided_slice %18 {offsets = [0, 32], sizes = [2, 32], strides = [1, 1]} : vector<2x64xf32> to vector<2x32xf32>
    %50 = vector.extract_strided_slice %48 {offsets = [0, 0], sizes = [2, 96], strides = [1, 1]} : vector<2x128xf32> to vector<2x96xf32>
    %51 = arith.negf %50 : vector<2x96xf32>
    %52 = math.exp %51 : vector<2x96xf32>
    %cst_21 = arith.constant 1.000000e+00 : f32
    %53 = vector.broadcast %cst_21 : f32 to vector<2x96xf32>
    %54 = arith.addf %53, %52 : vector<2x96xf32>
    %55 = arith.divf %53, %54 : vector<2x96xf32>
    %56 = vector.extract_strided_slice %48 {offsets = [0, 96], sizes = [2, 32], strides = [1, 1]} : vector<2x128xf32> to vector<2x32xf32>
    %57 = math.tanh %56 : vector<2x32xf32>
    %58 = vector.extract_strided_slice %55 {offsets = [0, 0], sizes = [2, 32], strides = [1, 1]} : vector<2x96xf32> to vector<2x32xf32>
    %59 = vector.extract_strided_slice %55 {offsets = [0, 32], sizes = [2, 32], strides = [1, 1]} : vector<2x96xf32> to vector<2x32xf32>
    %60 = vector.extract_strided_slice %55 {offsets = [0, 64], sizes = [2, 32], strides = [1, 1]} : vector<2x96xf32> to vector<2x32xf32>
    %61 = arith.mulf %59, %49 : vector<2x32xf32>
    %62 = arith.mulf %58, %57 : vector<2x32xf32>
    %63 = arith.addf %61, %62 : vector<2x32xf32>
    %64 = math.tanh %63 : vector<2x32xf32>
    %65 = arith.mulf %60, %64 : vector<2x32xf32>
    %66 = arith.index_cast %c0_i32_16 : i32 to index
    %c0_22 = arith.constant 0 : index
    %c0_23 = arith.constant 0 : index
    %67 = vector.load %arg7[%66, %c0_22, %c0_23] : memref<8x2x32xf32, #tpu.memory_space<vmem>>, vector<1x2x32xf32>
    %68 = vector.shape_cast %67 : vector<1x2x32xf32> to vector<2x32xf32>
    %69 = vector.shape_cast %65 : vector<2x32xf32> to vector<1x2x32xf32>
    tpu.vector_store %arg7[%66, %c0_22, %c0_23], %69 {strides = array<i32>} : memref<8x2x32xf32, #tpu.memory_space<vmem>>, vector<1x2x32xf32>,
    %70 = tpu.concatenate %43, %65 in 1 : vector<2x32xf32>, vector<2x32xf32> -> vector<2x64xf32>
    %71 = tpu.concatenate %41, %63 in 1 : vector<2x32xf32>, vector<2x32xf32> -> vector<2x64xf32>
    %c1_i32 = arith.constant 1 : i32
    %c2_i32_24 = arith.constant 2 : i32
    %72 = arith.muli %c1_i32, %c2_i32_24 : i32
    %73 = tpu.assume_multiple %72, 2 : i32
    %74 = arith.truncf %70 : vector<2x64xf32> to vector<2x64xbf16>
    %cst_25 = arith.constant dense<0.000000e+00> : vector<2x256xf32>
    %75 = tpu.matmul %74, %11, %cst_25 {dimension_numbers = #tpu.dot_dimension_numbers<[1], [0], [0], [1], [0, 0, 1, 1], [], []>} : vector<2x64xbf16>, vector<64x256xbf16>, vector<2x256xf32> -> vector<2x256xf32>
    %76 = arith.index_cast %73 : i32 to index
    %c0_26 = arith.constant 0 : index
    %77 = vector.load %arg10[%76, %c0_26] : memref<16x128xf32, #tpu.memory_space<vmem>>, vector<2x128xf32>
    %78 = vector.extract_strided_slice %75 {offsets = [0, 0], sizes = [2, 128], strides = [1, 1]} : vector<2x256xf32> to vector<2x128xf32>
    %79 = arith.addf %77, %78 : vector<2x128xf32>
    %80 = vector.extract_strided_slice %71 {offsets = [0, 0], sizes = [2, 32], strides = [1, 1]} : vector<2x64xf32> to vector<2x32xf32>
    %81 = vector.extract_strided_slice %79 {offsets = [0, 0], sizes = [2, 96], strides = [1, 1]} : vector<2x128xf32> to vector<2x96xf32>
    %82 = arith.negf %81 : vector<2x96xf32>
    %83 = math.exp %82 : vector<2x96xf32>
    %cst_27 = arith.constant 1.000000e+00 : f32
    %84 = vector.broadcast %cst_27 : f32 to vector<2x96xf32>
    %85 = arith.addf %84, %83 : vector<2x96xf32>
    %86 = arith.divf %84, %85 : vector<2x96xf32>
    %87 = vector.extract_strided_slice %79 {offsets = [0, 96], sizes = [2, 32], strides = [1, 1]} : vector<2x128xf32> to vector<2x32xf32>
    %88 = math.tanh %87 : vector<2x32xf32>
    %89 = vector.extract_strided_slice %86 {offsets = [0, 0], sizes = [2, 32], strides = [1, 1]} : vector<2x96xf32> to vector<2x32xf32>
    %90 = vector.extract_strided_slice %86 {offsets = [0, 32], sizes = [2, 32], strides = [1, 1]} : vector<2x96xf32> to vector<2x32xf32>
    %91 = vector.extract_strided_slice %86 {offsets = [0, 64], sizes = [2, 32], strides = [1, 1]} : vector<2x96xf32> to vector<2x32xf32>
    %92 = arith.mulf %90, %80 : vector<2x32xf32>
    %93 = arith.mulf %89, %88 : vector<2x32xf32>
    %94 = arith.addf %92, %93 : vector<2x32xf32>
    %95 = math.tanh %94 : vector<2x32xf32>
    %96 = arith.mulf %91, %95 : vector<2x32xf32>
    %97 = arith.truncf %96 : vector<2x32xf32> to vector<2x32xbf16>
    %cst_28 = arith.constant dense<0.000000e+00> : vector<2x128xf32>
    %98 = tpu.matmul %97, %12, %cst_28 {dimension_numbers = #tpu.dot_dimension_numbers<[1], [0], [0], [1], [0, 0, 1, 1], [], []>} : vector<2x32xbf16>, vector<32x128xbf16>, vector<2x128xf32> -> vector<2x128xf32>
    %99 = vector.extract_strided_slice %75 {offsets = [0, 128], sizes = [2, 128], strides = [1, 1]} : vector<2x256xf32> to vector<2x128xf32>
    %100 = arith.addf %98, %99 : vector<2x128xf32>
    %101 = arith.addf %100, %15 : vector<2x128xf32>
    %102 = vector.extract_strided_slice %71 {offsets = [0, 32], sizes = [2, 32], strides = [1, 1]} : vector<2x64xf32> to vector<2x32xf32>
    %103 = vector.extract_strided_slice %101 {offsets = [0, 0], sizes = [2, 96], strides = [1, 1]} : vector<2x128xf32> to vector<2x96xf32>
    %104 = arith.negf %103 : vector<2x96xf32>
    %105 = math.exp %104 : vector<2x96xf32>
    %cst_29 = arith.constant 1.000000e+00 : f32
    %106 = vector.broadcast %cst_29 : f32 to vector<2x96xf32>
    %107 = arith.addf %106, %105 : vector<2x96xf32>
    %108 = arith.divf %106, %107 : vector<2x96xf32>
    %109 = vector.extract_strided_slice %101 {offsets = [0, 96], sizes = [2, 32], strides = [1, 1]} : vector<2x128xf32> to vector<2x32xf32>
    %110 = math.tanh %109 : vector<2x32xf32>
    %111 = vector.extract_strided_slice %108 {offsets = [0, 0], sizes = [2, 32], strides = [1, 1]} : vector<2x96xf32> to vector<2x32xf32>
    %112 = vector.extract_strided_slice %108 {offsets = [0, 32], sizes = [2, 32], strides = [1, 1]} : vector<2x96xf32> to vector<2x32xf32>
    %113 = vector.extract_strided_slice %108 {offsets = [0, 64], sizes = [2, 32], strides = [1, 1]} : vector<2x96xf32> to vector<2x32xf32>
    %114 = arith.mulf %112, %102 : vector<2x32xf32>
    %115 = arith.mulf %111, %110 : vector<2x32xf32>
    %116 = arith.addf %114, %115 : vector<2x32xf32>
    %117 = math.tanh %116 : vector<2x32xf32>
    %118 = arith.mulf %113, %117 : vector<2x32xf32>
    %119 = arith.index_cast %c1_i32 : i32 to index
    %c0_30 = arith.constant 0 : index
    %c0_31 = arith.constant 0 : index
    %120 = vector.load %arg7[%119, %c0_30, %c0_31] : memref<8x2x32xf32, #tpu.memory_space<vmem>>, vector<1x2x32xf32>
    %121 = vector.shape_cast %120 : vector<1x2x32xf32> to vector<2x32xf32>
    %122 = vector.shape_cast %118 : vector<2x32xf32> to vector<1x2x32xf32>
    tpu.vector_store %arg7[%119, %c0_30, %c0_31], %122 {strides = array<i32>} : memref<8x2x32xf32, #tpu.memory_space<vmem>>, vector<1x2x32xf32>,
    %123 = tpu.concatenate %96, %118 in 1 : vector<2x32xf32>, vector<2x32xf32> -> vector<2x64xf32>
    %124 = tpu.concatenate %94, %116 in 1 : vector<2x32xf32>, vector<2x32xf32> -> vector<2x64xf32>
    %c2_i32_32 = arith.constant 2 : i32
    %c2_i32_33 = arith.constant 2 : i32
    %125 = arith.muli %c2_i32_32, %c2_i32_33 : i32
    %126 = tpu.assume_multiple %125, 2 : i32
    %127 = arith.truncf %123 : vector<2x64xf32> to vector<2x64xbf16>
    %cst_34 = arith.constant dense<0.000000e+00> : vector<2x256xf32>
    %128 = tpu.matmul %127, %11, %cst_34 {dimension_numbers = #tpu.dot_dimension_numbers<[1], [0], [0], [1], [0, 0, 1, 1], [], []>} : vector<2x64xbf16>, vector<64x256xbf16>, vector<2x256xf32> -> vector<2x256xf32>
    %129 = arith.index_cast %126 : i32 to index
    %c0_35 = arith.constant 0 : index
    %130 = vector.load %arg10[%129, %c0_35] : memref<16x128xf32, #tpu.memory_space<vmem>>, vector<2x128xf32>
    %131 = vector.extract_strided_slice %128 {offsets = [0, 0], sizes = [2, 128], strides = [1, 1]} : vector<2x256xf32> to vector<2x128xf32>
    %132 = arith.addf %130, %131 : vector<2x128xf32>
    %133 = vector.extract_strided_slice %124 {offsets = [0, 0], sizes = [2, 32], strides = [1, 1]} : vector<2x64xf32> to vector<2x32xf32>
    %134 = vector.extract_strided_slice %132 {offsets = [0, 0], sizes = [2, 96], strides = [1, 1]} : vector<2x128xf32> to vector<2x96xf32>
    %135 = arith.negf %134 : vector<2x96xf32>
    %136 = math.exp %135 : vector<2x96xf32>
    %cst_36 = arith.constant 1.000000e+00 : f32
    %137 = vector.broadcast %cst_36 : f32 to vector<2x96xf32>
    %138 = arith.addf %137, %136 : vector<2x96xf32>
    %139 = arith.divf %137, %138 : vector<2x96xf32>
    %140 = vector.extract_strided_slice %132 {offsets = [0, 96], sizes = [2, 32], strides = [1, 1]} : vector<2x128xf32> to vector<2x32xf32>
    %141 = math.tanh %140 : vector<2x32xf32>
    %142 = vector.extract_strided_slice %139 {offsets = [0, 0], sizes = [2, 32], strides = [1, 1]} : vector<2x96xf32> to vector<2x32xf32>
    %143 = vector.extract_strided_slice %139 {offsets = [0, 32], sizes = [2, 32], strides = [1, 1]} : vector<2x96xf32> to vector<2x32xf32>
    %144 = vector.extract_strided_slice %139 {offsets = [0, 64], sizes = [2, 32], strides = [1, 1]} : vector<2x96xf32> to vector<2x32xf32>
    %145 = arith.mulf %143, %133 : vector<2x32xf32>
    %146 = arith.mulf %142, %141 : vector<2x32xf32>
    %147 = arith.addf %145, %146 : vector<2x32xf32>
    %148 = math.tanh %147 : vector<2x32xf32>
    %149 = arith.mulf %144, %148 : vector<2x32xf32>
    %150 = arith.truncf %149 : vector<2x32xf32> to vector<2x32xbf16>
    %cst_37 = arith.constant dense<0.000000e+00> : vector<2x128xf32>
    %151 = tpu.matmul %150, %12, %cst_37 {dimension_numbers = #tpu.dot_dimension_numbers<[1], [0], [0], [1], [0, 0, 1, 1], [], []>} : vector<2x32xbf16>, vector<32x128xbf16>, vector<2x128xf32> -> vector<2x128xf32>
    %152 = vector.extract_strided_slice %128 {offsets = [0, 128], sizes = [2, 128], strides = [1, 1]} : vector<2x256xf32> to vector<2x128xf32>
    %153 = arith.addf %151, %152 : vector<2x128xf32>
    %154 = arith.addf %153, %15 : vector<2x128xf32>
    %155 = vector.extract_strided_slice %124 {offsets = [0, 32], sizes = [2, 32], strides = [1, 1]} : vector<2x64xf32> to vector<2x32xf32>
    %156 = vector.extract_strided_slice %154 {offsets = [0, 0], sizes = [2, 96], strides = [1, 1]} : vector<2x128xf32> to vector<2x96xf32>
    %157 = arith.negf %156 : vector<2x96xf32>
    %158 = math.exp %157 : vector<2x96xf32>
    %cst_38 = arith.constant 1.000000e+00 : f32
    %159 = vector.broadcast %cst_38 : f32 to vector<2x96xf32>
    %160 = arith.addf %159, %158 : vector<2x96xf32>
    %161 = arith.divf %159, %160 : vector<2x96xf32>
    %162 = vector.extract_strided_slice %154 {offsets = [0, 96], sizes = [2, 32], strides = [1, 1]} : vector<2x128xf32> to vector<2x32xf32>
    %163 = math.tanh %162 : vector<2x32xf32>
    %164 = vector.extract_strided_slice %161 {offsets = [0, 0], sizes = [2, 32], strides = [1, 1]} : vector<2x96xf32> to vector<2x32xf32>
    %165 = vector.extract_strided_slice %161 {offsets = [0, 32], sizes = [2, 32], strides = [1, 1]} : vector<2x96xf32> to vector<2x32xf32>
    %166 = vector.extract_strided_slice %161 {offsets = [0, 64], sizes = [2, 32], strides = [1, 1]} : vector<2x96xf32> to vector<2x32xf32>
    %167 = arith.mulf %165, %155 : vector<2x32xf32>
    %168 = arith.mulf %164, %163 : vector<2x32xf32>
    %169 = arith.addf %167, %168 : vector<2x32xf32>
    %170 = math.tanh %169 : vector<2x32xf32>
    %171 = arith.mulf %166, %170 : vector<2x32xf32>
    %172 = arith.index_cast %c2_i32_32 : i32 to index
    %c0_39 = arith.constant 0 : index
    %c0_40 = arith.constant 0 : index
    %173 = vector.load %arg7[%172, %c0_39, %c0_40] : memref<8x2x32xf32, #tpu.memory_space<vmem>>, vector<1x2x32xf32>
    %174 = vector.shape_cast %173 : vector<1x2x32xf32> to vector<2x32xf32>
    %175 = vector.shape_cast %171 : vector<2x32xf32> to vector<1x2x32xf32>
    tpu.vector_store %arg7[%172, %c0_39, %c0_40], %175 {strides = array<i32>} : memref<8x2x32xf32, #tpu.memory_space<vmem>>, vector<1x2x32xf32>,
    %176 = tpu.concatenate %149, %171 in 1 : vector<2x32xf32>, vector<2x32xf32> -> vector<2x64xf32>
    %177 = tpu.concatenate %147, %169 in 1 : vector<2x32xf32>, vector<2x32xf32> -> vector<2x64xf32>
    %c3_i32 = arith.constant 3 : i32
    %c2_i32_41 = arith.constant 2 : i32
    %178 = arith.muli %c3_i32, %c2_i32_41 : i32
    %179 = tpu.assume_multiple %178, 2 : i32
    %180 = arith.truncf %176 : vector<2x64xf32> to vector<2x64xbf16>
    %cst_42 = arith.constant dense<0.000000e+00> : vector<2x256xf32>
    %181 = tpu.matmul %180, %11, %cst_42 {dimension_numbers = #tpu.dot_dimension_numbers<[1], [0], [0], [1], [0, 0, 1, 1], [], []>} : vector<2x64xbf16>, vector<64x256xbf16>, vector<2x256xf32> -> vector<2x256xf32>
    %182 = arith.index_cast %179 : i32 to index
    %c0_43 = arith.constant 0 : index
    %183 = vector.load %arg10[%182, %c0_43] : memref<16x128xf32, #tpu.memory_space<vmem>>, vector<2x128xf32>
    %184 = vector.extract_strided_slice %181 {offsets = [0, 0], sizes = [2, 128], strides = [1, 1]} : vector<2x256xf32> to vector<2x128xf32>
    %185 = arith.addf %183, %184 : vector<2x128xf32>
    %186 = vector.extract_strided_slice %177 {offsets = [0, 0], sizes = [2, 32], strides = [1, 1]} : vector<2x64xf32> to vector<2x32xf32>
    %187 = vector.extract_strided_slice %185 {offsets = [0, 0], sizes = [2, 96], strides = [1, 1]} : vector<2x128xf32> to vector<2x96xf32>
    %188 = arith.negf %187 : vector<2x96xf32>
    %189 = math.exp %188 : vector<2x96xf32>
    %cst_44 = arith.constant 1.000000e+00 : f32
    %190 = vector.broadcast %cst_44 : f32 to vector<2x96xf32>
    %191 = arith.addf %190, %189 : vector<2x96xf32>
    %192 = arith.divf %190, %191 : vector<2x96xf32>
    %193 = vector.extract_strided_slice %185 {offsets = [0, 96], sizes = [2, 32], strides = [1, 1]} : vector<2x128xf32> to vector<2x32xf32>
    %194 = math.tanh %193 : vector<2x32xf32>
    %195 = vector.extract_strided_slice %192 {offsets = [0, 0], sizes = [2, 32], strides = [1, 1]} : vector<2x96xf32> to vector<2x32xf32>
    %196 = vector.extract_strided_slice %192 {offsets = [0, 32], sizes = [2, 32], strides = [1, 1]} : vector<2x96xf32> to vector<2x32xf32>
    %197 = vector.extract_strided_slice %192 {offsets = [0, 64], sizes = [2, 32], strides = [1, 1]} : vector<2x96xf32> to vector<2x32xf32>
    %198 = arith.mulf %196, %186 : vector<2x32xf32>
    %199 = arith.mulf %195, %194 : vector<2x32xf32>
    %200 = arith.addf %198, %199 : vector<2x32xf32>
    %201 = math.tanh %200 : vector<2x32xf32>
    %202 = arith.mulf %197, %201 : vector<2x32xf32>
    %203 = arith.truncf %202 : vector<2x32xf32> to vector<2x32xbf16>
    %cst_45 = arith.constant dense<0.000000e+00> : vector<2x128xf32>
    %204 = tpu.matmul %203, %12, %cst_45 {dimension_numbers = #tpu.dot_dimension_numbers<[1], [0], [0], [1], [0, 0, 1, 1], [], []>} : vector<2x32xbf16>, vector<32x128xbf16>, vector<2x128xf32> -> vector<2x128xf32>
    %205 = vector.extract_strided_slice %181 {offsets = [0, 128], sizes = [2, 128], strides = [1, 1]} : vector<2x256xf32> to vector<2x128xf32>
    %206 = arith.addf %204, %205 : vector<2x128xf32>
    %207 = arith.addf %206, %15 : vector<2x128xf32>
    %208 = vector.extract_strided_slice %177 {offsets = [0, 32], sizes = [2, 32], strides = [1, 1]} : vector<2x64xf32> to vector<2x32xf32>
    %209 = vector.extract_strided_slice %207 {offsets = [0, 0], sizes = [2, 96], strides = [1, 1]} : vector<2x128xf32> to vector<2x96xf32>
    %210 = arith.negf %209 : vector<2x96xf32>
    %211 = math.exp %210 : vector<2x96xf32>
    %cst_46 = arith.constant 1.000000e+00 : f32
    %212 = vector.broadcast %cst_46 : f32 to vector<2x96xf32>
    %213 = arith.addf %212, %211 : vector<2x96xf32>
    %214 = arith.divf %212, %213 : vector<2x96xf32>
    %215 = vector.extract_strided_slice %207 {offsets = [0, 96], sizes = [2, 32], strides = [1, 1]} : vector<2x128xf32> to vector<2x32xf32>
    %216 = math.tanh %215 : vector<2x32xf32>
    %217 = vector.extract_strided_slice %214 {offsets = [0, 0], sizes = [2, 32], strides = [1, 1]} : vector<2x96xf32> to vector<2x32xf32>
    %218 = vector.extract_strided_slice %214 {offsets = [0, 32], sizes = [2, 32], strides = [1, 1]} : vector<2x96xf32> to vector<2x32xf32>
    %219 = vector.extract_strided_slice %214 {offsets = [0, 64], sizes = [2, 32], strides = [1, 1]} : vector<2x96xf32> to vector<2x32xf32>
    %220 = arith.mulf %218, %208 : vector<2x32xf32>
    %221 = arith.mulf %217, %216 : vector<2x32xf32>
    %222 = arith.addf %220, %221 : vector<2x32xf32>
    %223 = math.tanh %222 : vector<2x32xf32>
    %224 = arith.mulf %219, %223 : vector<2x32xf32>
    %225 = arith.index_cast %c3_i32 : i32 to index
    %c0_47 = arith.constant 0 : index
    %c0_48 = arith.constant 0 : index
    %226 = vector.load %arg7[%225, %c0_47, %c0_48] : memref<8x2x32xf32, #tpu.memory_space<vmem>>, vector<1x2x32xf32>
    %227 = vector.shape_cast %226 : vector<1x2x32xf32> to vector<2x32xf32>
    %228 = vector.shape_cast %224 : vector<2x32xf32> to vector<1x2x32xf32>
    tpu.vector_store %arg7[%225, %c0_47, %c0_48], %228 {strides = array<i32>} : memref<8x2x32xf32, #tpu.memory_space<vmem>>, vector<1x2x32xf32>,
    %229 = tpu.concatenate %202, %224 in 1 : vector<2x32xf32>, vector<2x32xf32> -> vector<2x64xf32>
    %230 = tpu.concatenate %200, %222 in 1 : vector<2x32xf32>, vector<2x32xf32> -> vector<2x64xf32>
    %c4_i32 = arith.constant 4 : i32
    %c2_i32_49 = arith.constant 2 : i32
    %231 = arith.muli %c4_i32, %c2_i32_49 : i32
    %232 = tpu.assume_multiple %231, 2 : i32
    %233 = arith.truncf %229 : vector<2x64xf32> to vector<2x64xbf16>
    %cst_50 = arith.constant dense<0.000000e+00> : vector<2x256xf32>
    %234 = tpu.matmul %233, %11, %cst_50 {dimension_numbers = #tpu.dot_dimension_numbers<[1], [0], [0], [1], [0, 0, 1, 1], [], []>} : vector<2x64xbf16>, vector<64x256xbf16>, vector<2x256xf32> -> vector<2x256xf32>
    %235 = arith.index_cast %232 : i32 to index
    %c0_51 = arith.constant 0 : index
    %236 = vector.load %arg10[%235, %c0_51] : memref<16x128xf32, #tpu.memory_space<vmem>>, vector<2x128xf32>
    %237 = vector.extract_strided_slice %234 {offsets = [0, 0], sizes = [2, 128], strides = [1, 1]} : vector<2x256xf32> to vector<2x128xf32>
    %238 = arith.addf %236, %237 : vector<2x128xf32>
    %239 = vector.extract_strided_slice %230 {offsets = [0, 0], sizes = [2, 32], strides = [1, 1]} : vector<2x64xf32> to vector<2x32xf32>
    %240 = vector.extract_strided_slice %238 {offsets = [0, 0], sizes = [2, 96], strides = [1, 1]} : vector<2x128xf32> to vector<2x96xf32>
    %241 = arith.negf %240 : vector<2x96xf32>
    %242 = math.exp %241 : vector<2x96xf32>
    %cst_52 = arith.constant 1.000000e+00 : f32
    %243 = vector.broadcast %cst_52 : f32 to vector<2x96xf32>
    %244 = arith.addf %243, %242 : vector<2x96xf32>
    %245 = arith.divf %243, %244 : vector<2x96xf32>
    %246 = vector.extract_strided_slice %238 {offsets = [0, 96], sizes = [2, 32], strides = [1, 1]} : vector<2x128xf32> to vector<2x32xf32>
    %247 = math.tanh %246 : vector<2x32xf32>
    %248 = vector.extract_strided_slice %245 {offsets = [0, 0], sizes = [2, 32], strides = [1, 1]} : vector<2x96xf32> to vector<2x32xf32>
    %249 = vector.extract_strided_slice %245 {offsets = [0, 32], sizes = [2, 32], strides = [1, 1]} : vector<2x96xf32> to vector<2x32xf32>
    %250 = vector.extract_strided_slice %245 {offsets = [0, 64], sizes = [2, 32], strides = [1, 1]} : vector<2x96xf32> to vector<2x32xf32>
    %251 = arith.mulf %249, %239 : vector<2x32xf32>
    %252 = arith.mulf %248, %247 : vector<2x32xf32>
    %253 = arith.addf %251, %252 : vector<2x32xf32>
    %254 = math.tanh %253 : vector<2x32xf32>
    %255 = arith.mulf %250, %254 : vector<2x32xf32>
    %256 = arith.truncf %255 : vector<2x32xf32> to vector<2x32xbf16>
    %cst_53 = arith.constant dense<0.000000e+00> : vector<2x128xf32>
    %257 = tpu.matmul %256, %12, %cst_53 {dimension_numbers = #tpu.dot_dimension_numbers<[1], [0], [0], [1], [0, 0, 1, 1], [], []>} : vector<2x32xbf16>, vector<32x128xbf16>, vector<2x128xf32> -> vector<2x128xf32>
    %258 = vector.extract_strided_slice %234 {offsets = [0, 128], sizes = [2, 128], strides = [1, 1]} : vector<2x256xf32> to vector<2x128xf32>
    %259 = arith.addf %257, %258 : vector<2x128xf32>
    %260 = arith.addf %259, %15 : vector<2x128xf32>
    %261 = vector.extract_strided_slice %230 {offsets = [0, 32], sizes = [2, 32], strides = [1, 1]} : vector<2x64xf32> to vector<2x32xf32>
    %262 = vector.extract_strided_slice %260 {offsets = [0, 0], sizes = [2, 96], strides = [1, 1]} : vector<2x128xf32> to vector<2x96xf32>
    %263 = arith.negf %262 : vector<2x96xf32>
    %264 = math.exp %263 : vector<2x96xf32>
    %cst_54 = arith.constant 1.000000e+00 : f32
    %265 = vector.broadcast %cst_54 : f32 to vector<2x96xf32>
    %266 = arith.addf %265, %264 : vector<2x96xf32>
    %267 = arith.divf %265, %266 : vector<2x96xf32>
    %268 = vector.extract_strided_slice %260 {offsets = [0, 96], sizes = [2, 32], strides = [1, 1]} : vector<2x128xf32> to vector<2x32xf32>
    %269 = math.tanh %268 : vector<2x32xf32>
    %270 = vector.extract_strided_slice %267 {offsets = [0, 0], sizes = [2, 32], strides = [1, 1]} : vector<2x96xf32> to vector<2x32xf32>
    %271 = vector.extract_strided_slice %267 {offsets = [0, 32], sizes = [2, 32], strides = [1, 1]} : vector<2x96xf32> to vector<2x32xf32>
    %272 = vector.extract_strided_slice %267 {offsets = [0, 64], sizes = [2, 32], strides = [1, 1]} : vector<2x96xf32> to vector<2x32xf32>
    %273 = arith.mulf %271, %261 : vector<2x32xf32>
    %274 = arith.mulf %270, %269 : vector<2x32xf32>
    %275 = arith.addf %273, %274 : vector<2x32xf32>
    %276 = math.tanh %275 : vector<2x32xf32>
    %277 = arith.mulf %272, %276 : vector<2x32xf32>
    %278 = arith.index_cast %c4_i32 : i32 to index
    %c0_55 = arith.constant 0 : index
    %c0_56 = arith.constant 0 : index
    %279 = vector.load %arg7[%278, %c0_55, %c0_56] : memref<8x2x32xf32, #tpu.memory_space<vmem>>, vector<1x2x32xf32>
    %280 = vector.shape_cast %279 : vector<1x2x32xf32> to vector<2x32xf32>
    %281 = vector.shape_cast %277 : vector<2x32xf32> to vector<1x2x32xf32>
    tpu.vector_store %arg7[%278, %c0_55, %c0_56], %281 {strides = array<i32>} : memref<8x2x32xf32, #tpu.memory_space<vmem>>, vector<1x2x32xf32>,
    %282 = tpu.concatenate %255, %277 in 1 : vector<2x32xf32>, vector<2x32xf32> -> vector<2x64xf32>
    %283 = tpu.concatenate %253, %275 in 1 : vector<2x32xf32>, vector<2x32xf32> -> vector<2x64xf32>
    %c5_i32 = arith.constant 5 : i32
    %c2_i32_57 = arith.constant 2 : i32
    %284 = arith.muli %c5_i32, %c2_i32_57 : i32
    %285 = tpu.assume_multiple %284, 2 : i32
    %286 = arith.truncf %282 : vector<2x64xf32> to vector<2x64xbf16>
    %cst_58 = arith.constant dense<0.000000e+00> : vector<2x256xf32>
    %287 = tpu.matmul %286, %11, %cst_58 {dimension_numbers = #tpu.dot_dimension_numbers<[1], [0], [0], [1], [0, 0, 1, 1], [], []>} : vector<2x64xbf16>, vector<64x256xbf16>, vector<2x256xf32> -> vector<2x256xf32>
    %288 = arith.index_cast %285 : i32 to index
    %c0_59 = arith.constant 0 : index
    %289 = vector.load %arg10[%288, %c0_59] : memref<16x128xf32, #tpu.memory_space<vmem>>, vector<2x128xf32>
    %290 = vector.extract_strided_slice %287 {offsets = [0, 0], sizes = [2, 128], strides = [1, 1]} : vector<2x256xf32> to vector<2x128xf32>
    %291 = arith.addf %289, %290 : vector<2x128xf32>
    %292 = vector.extract_strided_slice %283 {offsets = [0, 0], sizes = [2, 32], strides = [1, 1]} : vector<2x64xf32> to vector<2x32xf32>
    %293 = vector.extract_strided_slice %291 {offsets = [0, 0], sizes = [2, 96], strides = [1, 1]} : vector<2x128xf32> to vector<2x96xf32>
    %294 = arith.negf %293 : vector<2x96xf32>
    %295 = math.exp %294 : vector<2x96xf32>
    %cst_60 = arith.constant 1.000000e+00 : f32
    %296 = vector.broadcast %cst_60 : f32 to vector<2x96xf32>
    %297 = arith.addf %296, %295 : vector<2x96xf32>
    %298 = arith.divf %296, %297 : vector<2x96xf32>
    %299 = vector.extract_strided_slice %291 {offsets = [0, 96], sizes = [2, 32], strides = [1, 1]} : vector<2x128xf32> to vector<2x32xf32>
    %300 = math.tanh %299 : vector<2x32xf32>
    %301 = vector.extract_strided_slice %298 {offsets = [0, 0], sizes = [2, 32], strides = [1, 1]} : vector<2x96xf32> to vector<2x32xf32>
    %302 = vector.extract_strided_slice %298 {offsets = [0, 32], sizes = [2, 32], strides = [1, 1]} : vector<2x96xf32> to vector<2x32xf32>
    %303 = vector.extract_strided_slice %298 {offsets = [0, 64], sizes = [2, 32], strides = [1, 1]} : vector<2x96xf32> to vector<2x32xf32>
    %304 = arith.mulf %302, %292 : vector<2x32xf32>
    %305 = arith.mulf %301, %300 : vector<2x32xf32>
    %306 = arith.addf %304, %305 : vector<2x32xf32>
    %307 = math.tanh %306 : vector<2x32xf32>
    %308 = arith.mulf %303, %307 : vector<2x32xf32>
    %309 = arith.truncf %308 : vector<2x32xf32> to vector<2x32xbf16>
    %cst_61 = arith.constant dense<0.000000e+00> : vector<2x128xf32>
    %310 = tpu.matmul %309, %12, %cst_61 {dimension_numbers = #tpu.dot_dimension_numbers<[1], [0], [0], [1], [0, 0, 1, 1], [], []>} : vector<2x32xbf16>, vector<32x128xbf16>, vector<2x128xf32> -> vector<2x128xf32>
    %311 = vector.extract_strided_slice %287 {offsets = [0, 128], sizes = [2, 128], strides = [1, 1]} : vector<2x256xf32> to vector<2x128xf32>
    %312 = arith.addf %310, %311 : vector<2x128xf32>
    %313 = arith.addf %312, %15 : vector<2x128xf32>
    %314 = vector.extract_strided_slice %283 {offsets = [0, 32], sizes = [2, 32], strides = [1, 1]} : vector<2x64xf32> to vector<2x32xf32>
    %315 = vector.extract_strided_slice %313 {offsets = [0, 0], sizes = [2, 96], strides = [1, 1]} : vector<2x128xf32> to vector<2x96xf32>
    %316 = arith.negf %315 : vector<2x96xf32>
    %317 = math.exp %316 : vector<2x96xf32>
    %cst_62 = arith.constant 1.000000e+00 : f32
    %318 = vector.broadcast %cst_62 : f32 to vector<2x96xf32>
    %319 = arith.addf %318, %317 : vector<2x96xf32>
    %320 = arith.divf %318, %319 : vector<2x96xf32>
    %321 = vector.extract_strided_slice %313 {offsets = [0, 96], sizes = [2, 32], strides = [1, 1]} : vector<2x128xf32> to vector<2x32xf32>
    %322 = math.tanh %321 : vector<2x32xf32>
    %323 = vector.extract_strided_slice %320 {offsets = [0, 0], sizes = [2, 32], strides = [1, 1]} : vector<2x96xf32> to vector<2x32xf32>
    %324 = vector.extract_strided_slice %320 {offsets = [0, 32], sizes = [2, 32], strides = [1, 1]} : vector<2x96xf32> to vector<2x32xf32>
    %325 = vector.extract_strided_slice %320 {offsets = [0, 64], sizes = [2, 32], strides = [1, 1]} : vector<2x96xf32> to vector<2x32xf32>
    %326 = arith.mulf %324, %314 : vector<2x32xf32>
    %327 = arith.mulf %323, %322 : vector<2x32xf32>
    %328 = arith.addf %326, %327 : vector<2x32xf32>
    %329 = math.tanh %328 : vector<2x32xf32>
    %330 = arith.mulf %325, %329 : vector<2x32xf32>
    %331 = arith.index_cast %c5_i32 : i32 to index
    %c0_63 = arith.constant 0 : index
    %c0_64 = arith.constant 0 : index
    %332 = vector.load %arg7[%331, %c0_63, %c0_64] : memref<8x2x32xf32, #tpu.memory_space<vmem>>, vector<1x2x32xf32>
    %333 = vector.shape_cast %332 : vector<1x2x32xf32> to vector<2x32xf32>
    %334 = vector.shape_cast %330 : vector<2x32xf32> to vector<1x2x32xf32>
    tpu.vector_store %arg7[%331, %c0_63, %c0_64], %334 {strides = array<i32>} : memref<8x2x32xf32, #tpu.memory_space<vmem>>, vector<1x2x32xf32>,
    %335 = tpu.concatenate %308, %330 in 1 : vector<2x32xf32>, vector<2x32xf32> -> vector<2x64xf32>
    %336 = tpu.concatenate %306, %328 in 1 : vector<2x32xf32>, vector<2x32xf32> -> vector<2x64xf32>
    %c6_i32 = arith.constant 6 : i32
    %c2_i32_65 = arith.constant 2 : i32
    %337 = arith.muli %c6_i32, %c2_i32_65 : i32
    %338 = tpu.assume_multiple %337, 2 : i32
    %339 = arith.truncf %335 : vector<2x64xf32> to vector<2x64xbf16>
    %cst_66 = arith.constant dense<0.000000e+00> : vector<2x256xf32>
    %340 = tpu.matmul %339, %11, %cst_66 {dimension_numbers = #tpu.dot_dimension_numbers<[1], [0], [0], [1], [0, 0, 1, 1], [], []>} : vector<2x64xbf16>, vector<64x256xbf16>, vector<2x256xf32> -> vector<2x256xf32>
    %341 = arith.index_cast %338 : i32 to index
    %c0_67 = arith.constant 0 : index
    %342 = vector.load %arg10[%341, %c0_67] : memref<16x128xf32, #tpu.memory_space<vmem>>, vector<2x128xf32>
    %343 = vector.extract_strided_slice %340 {offsets = [0, 0], sizes = [2, 128], strides = [1, 1]} : vector<2x256xf32> to vector<2x128xf32>
    %344 = arith.addf %342, %343 : vector<2x128xf32>
    %345 = vector.extract_strided_slice %336 {offsets = [0, 0], sizes = [2, 32], strides = [1, 1]} : vector<2x64xf32> to vector<2x32xf32>
    %346 = vector.extract_strided_slice %344 {offsets = [0, 0], sizes = [2, 96], strides = [1, 1]} : vector<2x128xf32> to vector<2x96xf32>
    %347 = arith.negf %346 : vector<2x96xf32>
    %348 = math.exp %347 : vector<2x96xf32>
    %cst_68 = arith.constant 1.000000e+00 : f32
    %349 = vector.broadcast %cst_68 : f32 to vector<2x96xf32>
    %350 = arith.addf %349, %348 : vector<2x96xf32>
    %351 = arith.divf %349, %350 : vector<2x96xf32>
    %352 = vector.extract_strided_slice %344 {offsets = [0, 96], sizes = [2, 32], strides = [1, 1]} : vector<2x128xf32> to vector<2x32xf32>
    %353 = math.tanh %352 : vector<2x32xf32>
    %354 = vector.extract_strided_slice %351 {offsets = [0, 0], sizes = [2, 32], strides = [1, 1]} : vector<2x96xf32> to vector<2x32xf32>
    %355 = vector.extract_strided_slice %351 {offsets = [0, 32], sizes = [2, 32], strides = [1, 1]} : vector<2x96xf32> to vector<2x32xf32>
    %356 = vector.extract_strided_slice %351 {offsets = [0, 64], sizes = [2, 32], strides = [1, 1]} : vector<2x96xf32> to vector<2x32xf32>
    %357 = arith.mulf %355, %345 : vector<2x32xf32>
    %358 = arith.mulf %354, %353 : vector<2x32xf32>
    %359 = arith.addf %357, %358 : vector<2x32xf32>
    %360 = math.tanh %359 : vector<2x32xf32>
    %361 = arith.mulf %356, %360 : vector<2x32xf32>
    %362 = arith.truncf %361 : vector<2x32xf32> to vector<2x32xbf16>
    %cst_69 = arith.constant dense<0.000000e+00> : vector<2x128xf32>
    %363 = tpu.matmul %362, %12, %cst_69 {dimension_numbers = #tpu.dot_dimension_numbers<[1], [0], [0], [1], [0, 0, 1, 1], [], []>} : vector<2x32xbf16>, vector<32x128xbf16>, vector<2x128xf32> -> vector<2x128xf32>
    %364 = vector.extract_strided_slice %340 {offsets = [0, 128], sizes = [2, 128], strides = [1, 1]} : vector<2x256xf32> to vector<2x128xf32>
    %365 = arith.addf %363, %364 : vector<2x128xf32>
    %366 = arith.addf %365, %15 : vector<2x128xf32>
    %367 = vector.extract_strided_slice %336 {offsets = [0, 32], sizes = [2, 32], strides = [1, 1]} : vector<2x64xf32> to vector<2x32xf32>
    %368 = vector.extract_strided_slice %366 {offsets = [0, 0], sizes = [2, 96], strides = [1, 1]} : vector<2x128xf32> to vector<2x96xf32>
    %369 = arith.negf %368 : vector<2x96xf32>
    %370 = math.exp %369 : vector<2x96xf32>
    %cst_70 = arith.constant 1.000000e+00 : f32
    %371 = vector.broadcast %cst_70 : f32 to vector<2x96xf32>
    %372 = arith.addf %371, %370 : vector<2x96xf32>
    %373 = arith.divf %371, %372 : vector<2x96xf32>
    %374 = vector.extract_strided_slice %366 {offsets = [0, 96], sizes = [2, 32], strides = [1, 1]} : vector<2x128xf32> to vector<2x32xf32>
    %375 = math.tanh %374 : vector<2x32xf32>
    %376 = vector.extract_strided_slice %373 {offsets = [0, 0], sizes = [2, 32], strides = [1, 1]} : vector<2x96xf32> to vector<2x32xf32>
    %377 = vector.extract_strided_slice %373 {offsets = [0, 32], sizes = [2, 32], strides = [1, 1]} : vector<2x96xf32> to vector<2x32xf32>
    %378 = vector.extract_strided_slice %373 {offsets = [0, 64], sizes = [2, 32], strides = [1, 1]} : vector<2x96xf32> to vector<2x32xf32>
    %379 = arith.mulf %377, %367 : vector<2x32xf32>
    %380 = arith.mulf %376, %375 : vector<2x32xf32>
    %381 = arith.addf %379, %380 : vector<2x32xf32>
    %382 = math.tanh %381 : vector<2x32xf32>
    %383 = arith.mulf %378, %382 : vector<2x32xf32>
    %384 = arith.index_cast %c6_i32 : i32 to index
    %c0_71 = arith.constant 0 : index
    %c0_72 = arith.constant 0 : index
    %385 = vector.load %arg7[%384, %c0_71, %c0_72] : memref<8x2x32xf32, #tpu.memory_space<vmem>>, vector<1x2x32xf32>
    %386 = vector.shape_cast %385 : vector<1x2x32xf32> to vector<2x32xf32>
    %387 = vector.shape_cast %383 : vector<2x32xf32> to vector<1x2x32xf32>
    tpu.vector_store %arg7[%384, %c0_71, %c0_72], %387 {strides = array<i32>} : memref<8x2x32xf32, #tpu.memory_space<vmem>>, vector<1x2x32xf32>,
    %388 = tpu.concatenate %361, %383 in 1 : vector<2x32xf32>, vector<2x32xf32> -> vector<2x64xf32>
    %389 = tpu.concatenate %359, %381 in 1 : vector<2x32xf32>, vector<2x32xf32> -> vector<2x64xf32>
    %c7_i32 = arith.constant 7 : i32
    %c2_i32_73 = arith.constant 2 : i32
    %390 = arith.muli %c7_i32, %c2_i32_73 : i32
    %391 = tpu.assume_multiple %390, 2 : i32
    %392 = arith.truncf %388 : vector<2x64xf32> to vector<2x64xbf16>
    %cst_74 = arith.constant dense<0.000000e+00> : vector<2x256xf32>
    %393 = tpu.matmul %392, %11, %cst_74 {dimension_numbers = #tpu.dot_dimension_numbers<[1], [0], [0], [1], [0, 0, 1, 1], [], []>} : vector<2x64xbf16>, vector<64x256xbf16>, vector<2x256xf32> -> vector<2x256xf32>
    %394 = arith.index_cast %391 : i32 to index
    %c0_75 = arith.constant 0 : index
    %395 = vector.load %arg10[%394, %c0_75] : memref<16x128xf32, #tpu.memory_space<vmem>>, vector<2x128xf32>
    %396 = vector.extract_strided_slice %393 {offsets = [0, 0], sizes = [2, 128], strides = [1, 1]} : vector<2x256xf32> to vector<2x128xf32>
    %397 = arith.addf %395, %396 : vector<2x128xf32>
    %398 = vector.extract_strided_slice %389 {offsets = [0, 0], sizes = [2, 32], strides = [1, 1]} : vector<2x64xf32> to vector<2x32xf32>
    %399 = vector.extract_strided_slice %397 {offsets = [0, 0], sizes = [2, 96], strides = [1, 1]} : vector<2x128xf32> to vector<2x96xf32>
    %400 = arith.negf %399 : vector<2x96xf32>
    %401 = math.exp %400 : vector<2x96xf32>
    %cst_76 = arith.constant 1.000000e+00 : f32
    %402 = vector.broadcast %cst_76 : f32 to vector<2x96xf32>
    %403 = arith.addf %402, %401 : vector<2x96xf32>
    %404 = arith.divf %402, %403 : vector<2x96xf32>
    %405 = vector.extract_strided_slice %397 {offsets = [0, 96], sizes = [2, 32], strides = [1, 1]} : vector<2x128xf32> to vector<2x32xf32>
    %406 = math.tanh %405 : vector<2x32xf32>
    %407 = vector.extract_strided_slice %404 {offsets = [0, 0], sizes = [2, 32], strides = [1, 1]} : vector<2x96xf32> to vector<2x32xf32>
    %408 = vector.extract_strided_slice %404 {offsets = [0, 32], sizes = [2, 32], strides = [1, 1]} : vector<2x96xf32> to vector<2x32xf32>
    %409 = vector.extract_strided_slice %404 {offsets = [0, 64], sizes = [2, 32], strides = [1, 1]} : vector<2x96xf32> to vector<2x32xf32>
    %410 = arith.mulf %408, %398 : vector<2x32xf32>
    %411 = arith.mulf %407, %406 : vector<2x32xf32>
    %412 = arith.addf %410, %411 : vector<2x32xf32>
    %413 = math.tanh %412 : vector<2x32xf32>
    %414 = arith.mulf %409, %413 : vector<2x32xf32>
    %415 = arith.truncf %414 : vector<2x32xf32> to vector<2x32xbf16>
    %cst_77 = arith.constant dense<0.000000e+00> : vector<2x128xf32>
    %416 = tpu.matmul %415, %12, %cst_77 {dimension_numbers = #tpu.dot_dimension_numbers<[1], [0], [0], [1], [0, 0, 1, 1], [], []>} : vector<2x32xbf16>, vector<32x128xbf16>, vector<2x128xf32> -> vector<2x128xf32>
    %417 = vector.extract_strided_slice %393 {offsets = [0, 128], sizes = [2, 128], strides = [1, 1]} : vector<2x256xf32> to vector<2x128xf32>
    %418 = arith.addf %416, %417 : vector<2x128xf32>
    %419 = arith.addf %418, %15 : vector<2x128xf32>
    %420 = vector.extract_strided_slice %389 {offsets = [0, 32], sizes = [2, 32], strides = [1, 1]} : vector<2x64xf32> to vector<2x32xf32>
    %421 = vector.extract_strided_slice %419 {offsets = [0, 0], sizes = [2, 96], strides = [1, 1]} : vector<2x128xf32> to vector<2x96xf32>
    %422 = arith.negf %421 : vector<2x96xf32>
    %423 = math.exp %422 : vector<2x96xf32>
    %cst_78 = arith.constant 1.000000e+00 : f32
    %424 = vector.broadcast %cst_78 : f32 to vector<2x96xf32>
    %425 = arith.addf %424, %423 : vector<2x96xf32>
    %426 = arith.divf %424, %425 : vector<2x96xf32>
    %427 = vector.extract_strided_slice %419 {offsets = [0, 96], sizes = [2, 32], strides = [1, 1]} : vector<2x128xf32> to vector<2x32xf32>
    %428 = math.tanh %427 : vector<2x32xf32>
    %429 = vector.extract_strided_slice %426 {offsets = [0, 0], sizes = [2, 32], strides = [1, 1]} : vector<2x96xf32> to vector<2x32xf32>
    %430 = vector.extract_strided_slice %426 {offsets = [0, 32], sizes = [2, 32], strides = [1, 1]} : vector<2x96xf32> to vector<2x32xf32>
    %431 = vector.extract_strided_slice %426 {offsets = [0, 64], sizes = [2, 32], strides = [1, 1]} : vector<2x96xf32> to vector<2x32xf32>
    %432 = arith.mulf %430, %420 : vector<2x32xf32>
    %433 = arith.mulf %429, %428 : vector<2x32xf32>
    %434 = arith.addf %432, %433 : vector<2x32xf32>
    %435 = math.tanh %434 : vector<2x32xf32>
    %436 = arith.mulf %431, %435 : vector<2x32xf32>
    %437 = arith.index_cast %c7_i32 : i32 to index
    %c0_79 = arith.constant 0 : index
    %c0_80 = arith.constant 0 : index
    %438 = vector.load %arg7[%437, %c0_79, %c0_80] : memref<8x2x32xf32, #tpu.memory_space<vmem>>, vector<1x2x32xf32>
    %439 = vector.shape_cast %438 : vector<1x2x32xf32> to vector<2x32xf32>
    %440 = vector.shape_cast %436 : vector<2x32xf32> to vector<1x2x32xf32>
    tpu.vector_store %arg7[%437, %c0_79, %c0_80], %440 {strides = array<i32>} : memref<8x2x32xf32, #tpu.memory_space<vmem>>, vector<1x2x32xf32>,
    %441 = tpu.concatenate %414, %436 in 1 : vector<2x32xf32>, vector<2x32xf32> -> vector<2x64xf32>
    %442 = tpu.concatenate %412, %434 in 1 : vector<2x32xf32>, vector<2x32xf32> -> vector<2x64xf32>
    %c8_i32 = arith.constant 8 : i32
    %443 = tpu.concatenate %441, %442 in 1 : vector<2x64xf32>, vector<2x64xf32> -> vector<2x128xf32>
    %c0_81 = arith.constant 0 : index
    %c0_82 = arith.constant 0 : index
    %444 = vector.load %arg11[%c0_81, %c0_82] : memref<2x128xf32, #tpu.memory_space<vmem>>, vector<2x128xf32>
    tpu.vector_store %arg11[%c0_81, %c0_82], %443 {strides = array<i32>} : memref<2x128xf32, #tpu.memory_space<vmem>>, vector<2x128xf32>,
    %c0_i32_83 = arith.constant 0 : i32
    %445 = arith.cmpi eq, %arg0, %c0_i32_83 : i32
    %446 = arith.extui %445 : i1 to i32
    %c0_i32_84 = arith.constant 0 : i32
    %447 = arith.cmpi ne, %446, %c0_i32_84 : i32
    scf.if %447 {
      %448 = vector.extract_strided_slice %441 {offsets = [0, 0], sizes = [2, 32], strides = [1, 1]} : vector<2x64xf32> to vector<2x32xf32>
      %c0_85 = arith.constant 0 : index
      %c0_86 = arith.constant 0 : index
      %c0_87 = arith.constant 0 : index
      %449 = vector.load %arg8[%c0_85, %c0_86, %c0_87] : memref<2x2x32xf32, #tpu.memory_space<vmem>>, vector<1x2x32xf32>
      %450 = vector.shape_cast %449 : vector<1x2x32xf32> to vector<2x32xf32>
      %451 = vector.shape_cast %448 : vector<2x32xf32> to vector<1x2x32xf32>
      tpu.vector_store %arg8[%c0_85, %c0_86, %c0_87], %451 {strides = array<i32>} : memref<2x2x32xf32, #tpu.memory_space<vmem>>, vector<1x2x32xf32>,
      %452 = vector.extract_strided_slice %441 {offsets = [0, 32], sizes = [2, 32], strides = [1, 1]} : vector<2x64xf32> to vector<2x32xf32>
      %c1 = arith.constant 1 : index
      %c0_88 = arith.constant 0 : index
      %c0_89 = arith.constant 0 : index
      %453 = vector.load %arg8[%c1, %c0_88, %c0_89] : memref<2x2x32xf32, #tpu.memory_space<vmem>>, vector<1x2x32xf32>
      %454 = vector.shape_cast %453 : vector<1x2x32xf32> to vector<2x32xf32>
      %455 = vector.shape_cast %452 : vector<2x32xf32> to vector<1x2x32xf32>
      tpu.vector_store %arg8[%c1, %c0_88, %c0_89], %455 {strides = array<i32>} : memref<2x2x32xf32, #tpu.memory_space<vmem>>, vector<1x2x32xf32>,
      %456 = vector.extract_strided_slice %442 {offsets = [0, 0], sizes = [2, 32], strides = [1, 1]} : vector<2x64xf32> to vector<2x32xf32>
      %c0_90 = arith.constant 0 : index
      %c0_91 = arith.constant 0 : index
      %c0_92 = arith.constant 0 : index
      %457 = vector.load %arg9[%c0_90, %c0_91, %c0_92] : memref<2x2x32xf32, #tpu.memory_space<vmem>>, vector<1x2x32xf32>
      %458 = vector.shape_cast %457 : vector<1x2x32xf32> to vector<2x32xf32>
      %459 = vector.shape_cast %456 : vector<2x32xf32> to vector<1x2x32xf32>
      tpu.vector_store %arg9[%c0_90, %c0_91, %c0_92], %459 {strides = array<i32>} : memref<2x2x32xf32, #tpu.memory_space<vmem>>, vector<1x2x32xf32>,
      %460 = vector.extract_strided_slice %442 {offsets = [0, 32], sizes = [2, 32], strides = [1, 1]} : vector<2x64xf32> to vector<2x32xf32>
      %c1_93 = arith.constant 1 : index
      %c0_94 = arith.constant 0 : index
      %c0_95 = arith.constant 0 : index
      %461 = vector.load %arg9[%c1_93, %c0_94, %c0_95] : memref<2x2x32xf32, #tpu.memory_space<vmem>>, vector<1x2x32xf32>
      %462 = vector.shape_cast %461 : vector<1x2x32xf32> to vector<2x32xf32>
      %463 = vector.shape_cast %460 : vector<2x32xf32> to vector<1x2x32xf32>
      tpu.vector_store %arg9[%c1_93, %c0_94, %c0_95], %463 {strides = array<i32>} : memref<2x2x32xf32, #tpu.memory_space<vmem>>, vector<1x2x32xf32>,
    } else {
    }
    return
  }
  func.func @transform_0(%arg0: i32) -> (i32, i32) {
    %c0_i32 = arith.constant 0 : i32
    %c0_i32_0 = arith.constant 0 : i32
    return %arg0, %c0_i32 : i32, i32
  }
  func.func @transform_1(%arg0: i32) -> (i32, i32) {
    %c0_i32 = arith.constant 0 : i32
    %c0_i32_0 = arith.constant 0 : i32
    %c0_i32_1 = arith.constant 0 : i32
    return %c0_i32, %c0_i32_0 : i32, i32
  }
  func.func @transform_2(%arg0: i32) -> (i32, i32) {
    %c0_i32 = arith.constant 0 : i32
    %c0_i32_0 = arith.constant 0 : i32
    %c0_i32_1 = arith.constant 0 : i32
    return %c0_i32, %c0_i32_0 : i32, i32
  }
  func.func @transform_3(%arg0: i32) -> (i32, i32) {
    %c0_i32 = arith.constant 0 : i32
    %c0_i32_0 = arith.constant 0 : i32
    %c0_i32_1 = arith.constant 0 : i32
    return %c0_i32, %c0_i32_0 : i32, i32
  }
  func.func @transform_4(%arg0: i32) -> (i32, i32) {
    %c0_i32 = arith.constant 0 : i32
    %c0_i32_0 = arith.constant 0 : i32
    %c0_i32_1 = arith.constant 0 : i32
    return %c0_i32, %c0_i32_0 : i32, i32
  }
  func.func @transform_5(%arg0: i32) -> (i32, i32) {
    %c0_i32 = arith.constant 0 : i32
    %c0_i32_0 = arith.constant 0 : i32
    %c0_i32_1 = arith.constant 0 : i32
    return %c0_i32, %c0_i32_0 : i32, i32
  }
  func.func @transform_6(%arg0: i32) -> (i32, i32, i32) {
    %c0_i32 = arith.constant 0 : i32
    %c0_i32_0 = arith.constant 0 : i32
    %c0_i32_1 = arith.constant 0 : i32
    return %arg0, %c0_i32, %c0_i32_0 : i32, i32, i32
  }
  func.func @transform_7(%arg0: i32) -> (i32, i32, i32) {
    %c0_i32 = arith.constant 0 : i32
    %c0_i32_0 = arith.constant 0 : i32
    %c0_i32_1 = arith.constant 0 : i32
    %c0_i32_2 = arith.constant 0 : i32
    return %c0_i32, %c0_i32_0, %c0_i32_1 : i32, i32, i32
  }
  func.func @transform_8(%arg0: i32) -> (i32, i32, i32) {
    %c0_i32 = arith.constant 0 : i32
    %c0_i32_0 = arith.constant 0 : i32
    %c0_i32_1 = arith.constant 0 : i32
    %c0_i32_2 = arith.constant 0 : i32
    return %c0_i32, %c0_i32_0, %c0_i32_1 : i32, i32, i32
  }
}

</mosaic_0001>

<bundles_post_ra>
// kernel: tpu_custom_call.1
= control target key start
LH: loop header
LB: loop body
LE: loop exit
PB: predicated region body
PF: predicated region fallthrough
CT: control target
= control target key end

     0   :  { %14 = vsyncpa [#allocation5], 0  ;;  %s2641_s0 = inlined_call_operand.hbm [shape: bf16[16,16], index: 0, kind: input, shape index: {}]   ;;  %s2642_s1 = inlined_call_operand.hbm [shape: bf16[16,128], index: 1, kind: input, shape index: {}]   ;;  %s2643_s2 = inlined_call_operand.hbm [shape: bf16[64,256], index: 2, kind: input, shape index: {}]   ;;  %s2644_s3 = inlined_call_operand.hbm [shape: bf16[32,128], index: 3, kind: input, shape index: {}]   ;;  %s2645_s4 = inlined_call_operand.vmem [shape: f32[1,128], index: 4, kind: input, shape index: {}]   ;;  %s2646_s5 = inlined_call_operand.vmem [shape: f32[1,128], index: 5, kind: input, shape index: {}]   ;;  %s2647_s6 = inlined_call_operand.hbm [shape: f32[8,2,32], index: 6, kind: output, shape index: {0}]   ;;  %s2648_s7 = inlined_call_operand.hbm [shape: f32[2,2,32], index: 7, kind: output, shape index: {1}]   ;;  %s2649_s8 = inlined_call_operand.hbm [shape: f32[2,2,32], index: 8, kind: output, shape index: {2}]  }
   0x1   :  { %15 = vsyncpa [#allocation8], 0 }
   0x2   :  { %16 = vsyncpa [#allocation11], 0 }
   0x3   :  { %17 = vsyncpa [#allocation6], 0 }
   0x4   :  { %18 = vsyncpa [#allocation14], 0  ;;  %s2118_s27 = smov [#allocation7]   ;;  %s2119_s29 = smov [#allocation4]  }
   0x5   :  { %s36_s28 = sshll.u32 %s2118_s27, 4  ;;  %s24_s30 = sshll.u32 %s2119_s29, 4  ;;  %s37_s28 = int_to_ptr.vmem [resolvable:$true] %s36_s28  ;;  %s2180_s30 = int_to_ptr.vmem [resolvable:$true] %s24_s30 }
   0x6   :  { %s1954_s11 = scalar_lea.hbm %s2642_s1, 128 }
   0x7   :  { %p1955_p0 = scmp.ne.s32.totalorder %s2642_s1, %s1954_s11  ;;  %p1958_p1 = scmp.lt.u32.totalorder %s1954_s11, %s2642_s1 }
   0x9   :  { %p1960_p2 = pnand %p1958_p1, %p1955_p0 }
   0xb   :  { %1963 = shalt.err (!%p1960_p2)
}
   0xc   :  { %s1964_s16 = scalar_lea.vmem %s37_s28, 128  ;;  %p1969_p4 = scmp.lt.s32.totalorder %s37_s28, %s37_s28 }
   0xd   :  { %p1965_p3 = scmp.ne.s32.totalorder %s37_s28, %s1964_s16  ;;  %p1970_p5 = scmp.lt.s32.totalorder %s1964_s16, %s1964_s16 }
   0xf   :  { %p1971_p6 = por %p1970_p5, %p1969_p4 }
  0x11   :  { %p1972_p7 = pnand %p1971_p6, %p1965_p3 }
  0x13   :  { %1975 = shalt.err (!%p1972_p7)
}
  0x14   :  { %s2120_s17 = smov 64   ;;  %s2121_s18 = smov 4  }
  0x15   :  { %42 = dma.hbm_to_vmem [thread:$0]  %s2642_s1, 128, %s37_s28, [#allocation8], %s2120_s17, %s2120_s17, %s2121_s18  }
  0x16   :  { %s1976_s23 = scalar_lea.hbm %s2641_s0, 128 }
  0x17   :  { %p1977_p8 = scmp.ne.s32.totalorder %s2641_s0, %s1976_s23  ;;  %p1980_p9 = scmp.lt.u32.totalorder %s1976_s23, %s2641_s0 }
  0x19   :  { %p1982_p10 = pnand %p1980_p9, %p1977_p8 }
  0x1b   :  { %1985 = shalt.err (!%p1982_p10)
}
  0x1c   :  { %s1986_s29 = scalar_lea.vmem %s2180_s30, 128  ;;  %p1991_p12 = scmp.lt.s32.totalorder %s2180_s30, %s2180_s30 }
  0x1d   :  { %p1987_p11 = scmp.ne.s32.totalorder %s2180_s30, %s1986_s29  ;;  %p1992_p13 = scmp.lt.s32.totalorder %s1986_s29, %s1986_s29 }
  0x1f   :  { %p1993_p0 = por %p1992_p13, %p1991_p12 }
  0x21   :  { %p1994_p1 = pnand %p1993_p0, %p1987_p11 }
  0x23   :  { %1997 = shalt.err (!%p1994_p1)
}
  0x24   :  { %30 = dma.hbm_to_vmem [thread:$0]  %s2641_s0, 128, %s2180_s30, [#allocation5], %s2120_s17, %s2120_s17, %s2121_s18  }
  0x25   :  { %s2122_s9 = smov [#allocation9]   ;;  %s1998_s13 = scalar_lea.hbm %s2643_s2, 1024 }
  0x26   :  { %s48_s10 = sshll.u32 %s2122_s9, 4  ;;  %p1999_p2 = scmp.ne.s32.totalorder %s2643_s2, %s1998_s13  ;;  %s49_s10 = int_to_ptr.vmem [resolvable:$true] %s48_s10 }
  0x27   :  { %p2002_p3 = scmp.lt.u32.totalorder %s1998_s13, %s2643_s2 }
  0x29   :  { %p2004_p4 = pnand %p2002_p3, %p1999_p2 }
  0x2b   :  { %2007 = shalt.err (!%p2004_p4)
}
  0x2c   :  { %s2008_s20 = scalar_lea.vmem %s49_s10, 1024  ;;  %p2013_p6 = scmp.lt.s32.totalorder %s49_s10, %s49_s10 }
  0x2d   :  { %p2009_p5 = scmp.ne.s32.totalorder %s49_s10, %s2008_s20  ;;  %p2014_p7 = scmp.lt.s32.totalorder %s2008_s20, %s2008_s20 }
  0x2f   :  { %p2015_p8 = por %p2014_p7, %p2013_p6 }
  0x31   :  { %p2016_p9 = pnand %p2015_p8, %p2009_p5 }
  0x33   :  { %2019 = shalt.err (!%p2016_p9)
}
  0x34   :  { %s2123_s0 = smov 128   ;;  %s2124_s30 = smov 8  }
  0x35   :  { %54 = dma.hbm_to_vmem [thread:$0]  %s2643_s2, 1024, %s49_s10, [#allocation8], %s2123_s0, %s2123_s0, %s2124_s30  }
  0x36   :  { %s2125_s23 = smov [#allocation10]   ;;  %s2020_s27 = scalar_lea.hbm %s2644_s3, 256 }
  0x37   :  { %s60_s24 = sshll.u32 %s2125_s23, 4  ;;  %p2021_p10 = scmp.ne.s32.totalorder %s2644_s3, %s2020_s27  ;;  %s61_s24 = int_to_ptr.vmem [resolvable:$true] %s60_s24 }
  0x38   :  { %p2024_p11 = scmp.lt.u32.totalorder %s2020_s27, %s2644_s3 }
  0x3a   :  { %p2026_p12 = pnand %p2024_p11, %p2021_p10 }
  0x3c   :  { %2029 = shalt.err (!%p2026_p12)
}
  0x3d   :  { %s2030_s11 = scalar_lea.vmem %s61_s24, 256  ;;  %p2035_p0 = scmp.lt.s32.totalorder %s61_s24, %s61_s24 }
  0x3e   :  { %p2031_p13 = scmp.ne.s32.totalorder %s61_s24, %s2030_s11  ;;  %p2036_p1 = scmp.lt.s32.totalorder %s2030_s11, %s2030_s11 }
  0x40   :  { %p2037_p2 = por %p2036_p1, %p2035_p0 }
  0x42   :  { %p2038_p3 = pnand %p2037_p2, %p2031_p13 }
  0x44   :  { %2041 = shalt.err (!%p2038_p3)
}
  0x45   :  { %66 = dma.hbm_to_vmem [thread:$0]  %s2644_s3, 256, %s61_s24, [#allocation11], %s2120_s17, %s2120_s17, %s2121_s18  }
  0x46   :  { %2108 = dma.done.wait [#allocation5], 128  }
  0x47   :  { %2109 = vsyncadd [#allocation5], 4294967168 }
  0x48   :  { %2110 = dma.done.wait [#allocation8], 1152  }
  0x49   :  { %2111 = vsyncadd [#allocation8], 4294966144 }
  0x4a   :  { %2112 = dma.done.wait [#allocation11], 256  }
  0x4b   :  { %2113 = vsyncadd [#allocation11], 4294967040  ;;  %v2126_v0 = vmov 0.0   ;;  %vm2127_vm0 = vmmov 0   ;;  %v2128_v1 = vmov 0   ;;  %v1802_v2 = vld [vmem:[#allocation7] sm:$0xff]  }
  0x4c   :  { %1715 = vmatprep.subr.bf16.mxu0 %v2126_v0  ;;  %88 = vst [vmem:[#allocation3] sm:$0x3] %v2126_v0  ;;  %1717 = vmatprep.mubr.msk.bf16.mxu0 %vm2127_vm0, %v2126_v0  ;;  %v2249_v3 = vld [vmem:[#allocation9 + $0x4] ss:$8 sps:$4 sm:$0xff]   ;;  %vm111_vm1 = vcmask 130048   ;;  %v1806_v5 = vld [vmem:[#allocation4] sm:$0xff]  }
  0x4d   :  { %255 = vmatprep.mubr.bf16.mxu1 %v2128_v1  ;;  %1716 = vmatpush3.bf16.msra.mxu0 %v1802_v2  ;;  %v2251_v4 = vld [vmem:[#allocation9] ss:$8 sps:$4 sm:$0xff]   ;;  %v2256_v6 = vld [vmem:[#allocation9 + $0x14] ss:$8 sps:$4 sm:$0xff]   ;;  %v2258_v7 = vld [vmem:[#allocation9 + $0x10] ss:$8 sps:$4 sm:$0xff]  }
  0x4e   :  { %223 = vmatprep.subr.bf16.mxu1 %v2249_v3  ;;  %1721 = vmatprep.subr.bf16.mxu0 %v2126_v0  ;;  %v2260_v8 = vld [vmem:[#allocation9 + $0x24] ss:$8 sps:$4 sm:$0xff]   ;;  %v2265_v9 = vld [vmem:[#allocation9 + $0x20] ss:$8 sps:$4 sm:$0xff]   ;;  %v2269_v10 = vld [vmem:[#allocation9 + $0x34] ss:$8 sps:$4 sm:$0xff]  }
  0x4f   :  { %224 = vmatpush1.bf16.msra.mxu1 %v2251_v4  ;;  %v2272_v11 = vld [vmem:[#allocation9 + $0x30] ss:$8 sps:$4 sm:$0xff]   ;;  %vm219_vm2 = vcmask 523264   ;;  %v1642_v14 = vld [vmem:[%s2645_s4] ss:$0 sm:$0xff]  ;;  %s2129_s12 = smov 32  }
  0x50   :  { %1718 = vmatmul.mubr.msk.bf16.vlgmr.msra.gmra.mrb[0].mxu0 %vm111_vm1, %v1806_v5  ;;  %225 = vmatprep.subr.bf16.mxu1 %v2256_v6  ;;  %s2130_s4 = smov 96   ;;  %v2286_v38 = vld [vmem:[#allocation10] sm:$0xff]   ;;  %v2289_v39 = vld [vmem:[#allocation10 + $0x8] sm:$0xff]   ;;  %vm310_vm3 = vcmask 261120   ;;  %v2314_v45 = vld [vmem:[%s2646_s5] ss:$0 sm:$0xff] }
  0x51   :  { %1725 = vmatprep.mubr.msk.bf16.mxu0 %vm2127_vm0, %v2126_v0  ;;  %1722 = vmatpush3.bf16.msra.mxu0 %v2286_v38  ;;  %vm386_vm4 = vcmask 254976  }
  0x52   :  { %1723 = vmatprep.subr.bf16.mxu0 %v2126_v0 }
  0x53   :  { %226 = vmatpush1.bf16.msra.mxu1 %v2258_v7  ;;  %v177_v12 = vld [vmem:[#allocation3] sm:$0x3] }
  0x54   :  { %227 = vmatprep.subr.bf16.mxu1 %v2260_v8  ;;  %v178_v13 = vpack.c.bf16 %v177_v12, %v177_v12 }
  0x55   :  { %1724 = vmatpush3.bf16.msra.mxu0 %v2289_v39 }
  0x56   :  { %405 = vmatprep.subr.bf16.mxu0 %v2249_v3 }
  0x57   :  { %228 = vmatpush1.bf16.msra.mxu1 %v2265_v9 }
  0x58   :  { %229 = vmatprep.subr.bf16.mxu1 %v2269_v10 }
  0x5b   :  { %230 = vmatpush1.bf16.msra.mxu1 %v2272_v11 }
  0x5c   :  { %1729 = vmatprep.subr.bf16.mxu1 %v2126_v0 }
  0x5e   :  { %1655 = vmatmul.mubr.msk.bf16.vlgmr.msra.gmra.mrb[0].mxu1 %vm219_vm2, %v178_v13 }
  0x5f   :  { %1733 = vmatprep.mubr.msk.bf16.mxu1 %vm2127_vm0, %v2126_v0  ;;  %1730 = vmatpush3.bf16.msra.mxu1 %v2286_v38 }
  0x60   :  { %1731 = vmatprep.subr.bf16.mxu1 %v2126_v0 }
  0x63   :  { %1732 = vmatpush3.bf16.msra.mxu1 %v2289_v39 }
  0x64   :  { %572 = vmatprep.subr.bf16.mxu1 %v2249_v3 }
 0x123   :  { %v149_v15 = vpop.f32.mrb[0].mxu0 }
 0x124   :  { %v150_v16 = vadd.f32 %v1642_v14, %v149_v15  ;;  %v1719_v17 = vpop.f32.mrb[1].mxu0 }
 0x125   :  { %v152_v18 = vpop.f32.mrb[2].mxu0 }
 0x126   :  { %156 = vst [vmem:[#allocation2] sm:$0xff] %v150_v16  ;;  %v153_v19 = vadd.f32 %v1642_v14, %v152_v18  ;;  %v1720_v20 = vpop.f32.mrb[3].mxu0 }
 0x128   :  { %157 = vst [vmem:[#allocation2 + $0x8] sm:$0xff] %v153_v19 }
 0x12d   :  { %v264_v21 = vld [vmem:[#allocation2] sm:$0x3]  ;;  %v447_v19 = vld [vmem:[#allocation2 + $0x2] sm:$0x3] }
 0x131   :  { %v257_v22 = vpop.f32.mrb[0].mxu1 }
 0x132   :  { %v265_v23 = vadd.f32 %v264_v21, %v257_v22  ;;  %v259_v24 = vpop.f32.mrb[1].mxu1 }
 0x133   :  { %v261_v25 = vpop.f32.mrb[2].mxu1 }
 0x134   :  { %1818 = vtanh.f32 %v265_v23  ;;  %v262_v26 = vpop.f32.mrb[3].mxu1  ;;  %v1656_v28 = vmul.f32 -1.442695, %v265_v23 }
 0x136   :  { %1820 = vpow2.f32 %v1656_v28 }
 0x13e   :  { %v1819_v27 = vpop.eup %1818 }
 0x13f   :  { %279 = vrot.lane.b32.xlu0 %v1819_v27, %s2129_s12 }
 0x140   :  { %v1821_v29 = vpop.eup %1820 }
 0x141   :  { %v269_v30 = vadd.f32 1.0, %v1821_v29 }
 0x143   :  { %274 = vrot.lane.b32.xlu0 %v177_v12, %s2130_s4  ;;  %1822 = vrcp.f32 %v269_v30 }
 0x14d   :  { %v1823_v31 = vpop.eup %1822 }
 0x1b1   :  { %v280_v32 = vpop.permute.xlu0 %279 }
 0x1b2   :  { %v282_v33 = vmul.f32 %v1823_v31, %v280_v32 }
 0x1b4   :  { %284 = vrot.lane.b32.xlu1 %v282_v33, %s2129_s12 }
 0x1b5   :  { %v275_v34 = vpop.permute.xlu0 %274 }
 0x1b6   :  { %v277_v35 = vmul.f32 %v1823_v31, %v275_v34 }
 0x226   :  { %v285_v36 = vpop.permute.xlu1 %284 }
 0x227   :  { %v287_v37 = vadd.f32 %v285_v36, %v277_v35 }
 0x229   :  { %1824 = vtanh.f32 %v287_v37 }
 0x233   :  { %v1825_v40 = vpop.eup %1824 }
 0x234   :  { %290 = vrot.lane.b32.xlu1 %v1825_v40, %s2129_s12 }
 0x2a6   :  { %v291_v41 = vpop.permute.xlu1 %290 }
 0x2a7   :  { %v293_v42 = vmul.f32 %v1823_v31, %v291_v41 }
 0x2a9   :  { %v294_v43 = vpack.c.bf16 %v293_v42, %v293_v42 }
 0x2ab   :  { %296 = vrot.lane.b32.xlu0 %v294_v43, %s2120_s17 }
 0x2af   :  { %362 = vrot.lane.b32.xlu0 %v177_v12, %s2120_s17 }
 0x31d   :  { %v297_v44 = vpop.permute.xlu0 %296 }
 0x31e   :  { %1726 = vmatmul.mubr.msk.bf16.vlgmr.msra.gmra.mrb[4].mxu0 %vm310_vm3, %v297_v44 }
 0x31f   :  { %406 = vmatpush1.bf16.msra.mxu0 %v2251_v4  ;;  %437 = vmatprep.mubr.bf16.mxu0 %v2128_v1 }
 0x320   :  { %407 = vmatprep.subr.bf16.mxu0 %v2256_v6 }
 0x321   :  { %v363_v59 = vpop.permute.xlu0 %362 }
 0x323   :  { %408 = vmatpush1.bf16.msra.mxu0 %v2258_v7 }
 0x324   :  { %409 = vmatprep.subr.bf16.mxu0 %v2260_v8 }
 0x327   :  { %410 = vmatpush1.bf16.msra.mxu0 %v2265_v9 }
 0x328   :  { %411 = vmatprep.subr.bf16.mxu0 %v2269_v10 }
 0x32b   :  { %412 = vmatpush1.bf16.msra.mxu0 %v2272_v11 }
 0x32c   :  { %1737 = vmatprep.subr.bf16.mxu0 %v2126_v0 }
 0x3f1   :  { %v348_v46 = vpop.f32.mrb[4].mxu0 }
 0x3f2   :  { %v349_v47 = vadd.f32 %v348_v46, %v259_v24  ;;  %v1727_v48 = vpop.f32.mrb[5].mxu0 }
 0x3f3   :  { %v351_v49 = vpop.f32.mrb[6].mxu0 }
 0x3f4   :  { %v354_v50 = vadd.f32 %v2314_v45, %v349_v47  ;;  %v1728_v51 = vpop.f32.mrb[7].mxu0 }
 0x3f6   :  { %1826 = vtanh.f32 %v354_v50  ;;  %v1660_v53 = vmul.f32 -1.442695, %v354_v50 }
 0x3f8   :  { %1828 = vpow2.f32 %v1660_v53 }
 0x400   :  { %v1827_v52 = vpop.eup %1826 }
 0x401   :  { %367 = vrot.lane.b32.xlu1 %v1827_v52, %s2129_s12 }
 0x402   :  { %v1829_v54 = vpop.eup %1828 }
 0x403   :  { %v358_v55 = vadd.f32 1.0, %v1829_v54 }
 0x405   :  { %1830 = vrcp.f32 %v358_v55 }
 0x40f   :  { %v1831_v56 = vpop.eup %1830 }
 0x410   :  { %v365_v60 = vmul.f32 %v1831_v56, %v363_v59 }
 0x473   :  { %v368_v57 = vpop.permute.xlu1 %367 }
 0x474   :  { %v370_v58 = vmul.f32 %v1831_v56, %v368_v57 }
 0x476   :  { %372 = vrot.lane.b32.xlu1 %v370_v58, %s2129_s12 }
 0x47a   :  { %389 = vrot.lane.b32.xlu1 %v293_v42, %s2120_s17 }
 0x47e   :  { %397 = vrot.lane.b32.xlu1 %v287_v37, %s2130_s4 }
 0x4e8   :  { %v373_v61 = vpop.permute.xlu1 %372 }
 0x4e9   :  { %v375_v62 = vadd.f32 %v373_v61, %v365_v60 }
 0x4eb   :  { %1832 = vtanh.f32 %v375_v62 }
 0x4ec   :  { %v390_v63 = vpop.permute.xlu1 %389 }
 0x4f0   :  { %v398_v2 = vpop.permute.xlu1 %397 }
 0x4f1   :  { %v2322_v5 = vsel %vm310_vm3, %v398_v2, %v375_v62 }
 0x4f2   :  { %457 = vrot.lane.b32.xlu1 %v2322_v5, %s2129_s12 }
 0x4f5   :  { %v1833_v12 = vpop.eup %1832 }
 0x4f6   :  { %378 = vrot.lane.b32.xlu0 %v1833_v12, %s2129_s12 }
 0x564   :  { %v458_v31 = vpop.permute.xlu1 %457 }
 0x568   :  { %v379_v13 = vpop.permute.xlu0 %378 }
 0x569   :  { %v2327_v14 = vmul.f32 %v1831_v56, %v379_v13 }
 0x56b   :  { %392 = vrot.lane.b32.xlu0 %v2327_v14, %s2130_s4 }
 0x5dd   :  { %v393_v15 = vpop.permute.xlu0 %392 }
 0x5de   :  { %v395_v16 = vsel %vm310_vm3, %v390_v63, %v393_v15 }
 0x5df   :  { %v401_v17 = vpack.c.bf16 %v395_v16, %v395_v16  ;;  %v614_v16 = vld [vmem:[#allocation2 + $0x4] sm:$0x3] }
 0x5e1   :  { %1661 = vmatmul.mubr.msk.bf16.vlgmr.msra.gmra.mrb[8].mxu0 %vm219_vm2, %v401_v17 }
 0x5e2   :  { %1738 = vmatpush3.bf16.msra.mxu0 %v2286_v38  ;;  %1741 = vmatprep.mubr.msk.bf16.mxu0 %vm2127_vm0, %v2126_v0 }
 0x5e3   :  { %1739 = vmatprep.subr.bf16.mxu0 %v2126_v0 }
 0x5e6   :  { %1740 = vmatpush3.bf16.msra.mxu0 %v2289_v39 }
 0x5e7   :  { %739 = vmatprep.subr.bf16.mxu0 %v2249_v3 }
 0x6b4   :  { %v439_v18 = vpop.f32.mrb[8].mxu0 }
 0x6b5   :  { %v448_v20 = vadd.f32 %v447_v19, %v439_v18  ;;  %v441_v21 = vpop.f32.mrb[9].mxu0 }
 0x6b6   :  { %v443_v22 = vpop.f32.mrb[10].mxu0 }
 0x6b7   :  { %1834 = vtanh.f32 %v448_v20  ;;  %v444_v23 = vpop.f32.mrb[11].mxu0  ;;  %v1662_v25 = vmul.f32 -1.442695, %v448_v20 }
 0x6b9   :  { %1836 = vpow2.f32 %v1662_v25 }
 0x6c1   :  { %v1835_v24 = vpop.eup %1834 }
 0x6c2   :  { %462 = vrot.lane.b32.xlu0 %v1835_v24, %s2129_s12 }
 0x6c3   :  { %v1837_v26 = vpop.eup %1836 }
 0x6c4   :  { %v452_v27 = vadd.f32 1.0, %v1837_v26 }
 0x6c6   :  { %1838 = vrcp.f32 %v452_v27 }
 0x6d0   :  { %v1839_v28 = vpop.eup %1838 }
 0x6d1   :  { %v460_v32 = vmul.f32 %v1839_v28, %v458_v31 }
 0x734   :  { %v463_v29 = vpop.permute.xlu0 %462 }
 0x735   :  { %v465_v30 = vmul.f32 %v1839_v28, %v463_v29 }
 0x737   :  { %467 = vrot.lane.b32.xlu0 %v465_v30, %s2129_s12 }
 0x7a9   :  { %v468_v33 = vpop.permute.xlu0 %467 }
 0x7aa   :  { %v470_v34 = vadd.f32 %v468_v33, %v460_v32 }
 0x7ac   :  { %1840 = vtanh.f32 %v470_v34 }
 0x7b6   :  { %v1841_v35 = vpop.eup %1840 }
 0x7b7   :  { %473 = vrot.lane.b32.xlu1 %v1841_v35, %s2129_s12 }
 0x829   :  { %v474_v36 = vpop.permute.xlu1 %473 }
 0x82a   :  { %v476_v37 = vmul.f32 %v1839_v28, %v474_v36 }
 0x82c   :  { %v477_v40 = vpack.c.bf16 %v476_v37, %v476_v37 }
 0x82e   :  { %479 = vrot.lane.b32.xlu0 %v477_v40, %s2120_s17 }
 0x8a0   :  { %v480_v41 = vpop.permute.xlu0 %479 }
 0x8a1   :  { %1734 = vmatmul.mubr.msk.bf16.vlgmr.msra.gmra.mrb[4].mxu1 %vm310_vm3, %v480_v41 }
 0x8a2   :  { %573 = vmatpush1.bf16.msra.mxu1 %v2251_v4  ;;  %604 = vmatprep.mubr.bf16.mxu1 %v2128_v1 }
 0x8a3   :  { %574 = vmatprep.subr.bf16.mxu1 %v2256_v6 }
 0x8a6   :  { %575 = vmatpush1.bf16.msra.mxu1 %v2258_v7 }
 0x8a7   :  { %576 = vmatprep.subr.bf16.mxu1 %v2260_v8 }
 0x8aa   :  { %577 = vmatpush1.bf16.msra.mxu1 %v2265_v9 }
 0x8ab   :  { %578 = vmatprep.subr.bf16.mxu1 %v2269_v10 }
 0x8ae   :  { %579 = vmatpush1.bf16.msra.mxu1 %v2272_v11 }
 0x8af   :  { %1745 = vmatprep.subr.bf16.mxu1 %v2126_v0 }
 0x974   :  { %v518_v42 = vpop.f32.mrb[4].mxu1 }
 0x975   :  { %v519_v43 = vadd.f32 %v518_v42, %v441_v21  ;;  %v1735_v44 = vpop.f32.mrb[5].mxu1 }
 0x976   :  { %v521_v46 = vpop.f32.mrb[6].mxu1 }
 0x977   :  { %v524_v47 = vadd.f32 %v2314_v45, %v519_v43  ;;  %v1736_v48 = vpop.f32.mrb[7].mxu1 }
 0x979   :  { %1842 = vtanh.f32 %v524_v47  ;;  %v1664_v50 = vmul.f32 -1.442695, %v524_v47 }
 0x97b   :  { %1844 = vpow2.f32 %v1664_v50 }
 0x983   :  { %v1843_v49 = vpop.eup %1842 }
 0x984   :  { %534 = vrot.lane.b32.xlu1 %v1843_v49, %s2129_s12 }
 0x985   :  { %v1845_v51 = vpop.eup %1844 }
 0x986   :  { %v528_v52 = vadd.f32 1.0, %v1845_v51 }
 0x988   :  { %1846 = vrcp.f32 %v528_v52 }
 0x992   :  { %v1847_v53 = vpop.eup %1846 }
 0x993   :  { %v532_v56 = vmul.f32 %v1847_v53, %v2322_v5 }
 0x9f6   :  { %v535_v54 = vpop.permute.xlu1 %534 }
 0x9f7   :  { %v537_v55 = vmul.f32 %v1847_v53, %v535_v54 }
 0x9f9   :  { %539 = vrot.lane.b32.xlu0 %v537_v55, %s2129_s12 }
 0x9fd   :  { %556 = vrot.lane.b32.xlu0 %v476_v37, %s2120_s17 }
 0xa01   :  { %564 = vrot.lane.b32.xlu0 %v470_v34, %s2130_s4 }
 0xa6b   :  { %v540_v57 = vpop.permute.xlu0 %539 }
 0xa6c   :  { %v542_v58 = vadd.f32 %v540_v57, %v532_v56 }
 0xa6e   :  { %1848 = vtanh.f32 %v542_v58 }
 0xa6f   :  { %v557_v59 = vpop.permute.xlu0 %556 }
 0xa73   :  { %v565_v60 = vpop.permute.xlu0 %564 }
 0xa74   :  { %v2360_v61 = vsel %vm310_vm3, %v565_v60, %v542_v58 }
 0xa75   :  { %624 = vrot.lane.b32.xlu0 %v2360_v61, %s2129_s12 }
 0xa78   :  { %v1849_v62 = vpop.eup %1848 }
 0xa79   :  { %545 = vrot.lane.b32.xlu1 %v1849_v62, %s2129_s12 }
 0xae7   :  { %v625_v28 = vpop.permute.xlu0 %624 }
 0xaeb   :  { %v546_v63 = vpop.permute.xlu1 %545 }
 0xaec   :  { %v2365_v2 = vmul.f32 %v1847_v53, %v546_v63 }
 0xaee   :  { %559 = vrot.lane.b32.xlu1 %v2365_v2, %s2130_s4 }
 0xb60   :  { %v560_v5 = vpop.permute.xlu1 %559 }
 0xb61   :  { %v562_v12 = vsel %vm310_vm3, %v557_v59, %v560_v5 }
 0xb62   :  { %v568_v13 = vpack.c.bf16 %v562_v12, %v562_v12 }
 0xb64   :  { %1665 = vmatmul.mubr.msk.bf16.vlgmr.msra.gmra.mrb[8].mxu1 %vm219_vm2, %v568_v13  ;;  %v781_v13 = vld [vmem:[#allocation2 + $0x6] sm:$0x3] }
 0xb65   :  { %1746 = vmatpush3.bf16.msra.mxu1 %v2286_v38  ;;  %1749 = vmatprep.mubr.msk.bf16.mxu1 %vm2127_vm0, %v2126_v0 }
 0xb66   :  { %1747 = vmatprep.subr.bf16.mxu1 %v2126_v0 }
 0xb69   :  { %1748 = vmatpush3.bf16.msra.mxu1 %v2289_v39 }
 0xb6a   :  { %906 = vmatprep.subr.bf16.mxu1 %v2249_v3 }
 0xc37   :  { %v606_v15 = vpop.f32.mrb[8].mxu1 }
 0xc38   :  { %v615_v17 = vadd.f32 %v614_v16, %v606_v15  ;;  %v608_v18 = vpop.f32.mrb[9].mxu1 }
 0xc39   :  { %v610_v19 = vpop.f32.mrb[10].mxu1 }
 0xc3a   :  { %1850 = vtanh.f32 %v615_v17  ;;  %v611_v20 = vpop.f32.mrb[11].mxu1  ;;  %v1666_v22 = vmul.f32 -1.442695, %v615_v17 }
 0xc3c   :  { %1852 = vpow2.f32 %v1666_v22 }
 0xc44   :  { %v1851_v21 = vpop.eup %1850 }
 0xc45   :  { %629 = vrot.lane.b32.xlu1 %v1851_v21, %s2129_s12 }
 0xc46   :  { %v1853_v23 = vpop.eup %1852 }
 0xc47   :  { %v619_v24 = vadd.f32 1.0, %v1853_v23 }
 0xc49   :  { %1854 = vrcp.f32 %v619_v24 }
 0xc53   :  { %v1855_v25 = vpop.eup %1854 }
 0xc54   :  { %v627_v29 = vmul.f32 %v1855_v25, %v625_v28 }
 0xcb7   :  { %v630_v26 = vpop.permute.xlu1 %629 }
 0xcb8   :  { %v632_v27 = vmul.f32 %v1855_v25, %v630_v26 }
 0xcba   :  { %634 = vrot.lane.b32.xlu1 %v632_v27, %s2129_s12 }
 0xd2c   :  { %v635_v30 = vpop.permute.xlu1 %634 }
 0xd2d   :  { %v637_v31 = vadd.f32 %v635_v30, %v627_v29 }
 0xd2f   :  { %1856 = vtanh.f32 %v637_v31 }
 0xd39   :  { %v1857_v32 = vpop.eup %1856 }
 0xd3a   :  { %640 = vrot.lane.b32.xlu0 %v1857_v32, %s2129_s12 }
 0xdac   :  { %v641_v33 = vpop.permute.xlu0 %640 }
 0xdad   :  { %v643_v34 = vmul.f32 %v1855_v25, %v641_v33 }
 0xdaf   :  { %v644_v35 = vpack.c.bf16 %v643_v34, %v643_v34 }
 0xdb1   :  { %646 = vrot.lane.b32.xlu1 %v644_v35, %s2120_s17 }
 0xe23   :  { %v647_v36 = vpop.permute.xlu1 %646 }
 0xe24   :  { %1742 = vmatmul.mubr.msk.bf16.vlgmr.msra.gmra.mrb[12].mxu0 %vm310_vm3, %v647_v36 }
 0xe25   :  { %740 = vmatpush1.bf16.msra.mxu0 %v2251_v4  ;;  %771 = vmatprep.mubr.bf16.mxu0 %v2128_v1 }
 0xe26   :  { %741 = vmatprep.subr.bf16.mxu0 %v2256_v6 }
 0xe29   :  { %742 = vmatpush1.bf16.msra.mxu0 %v2258_v7 }
 0xe2a   :  { %743 = vmatprep.subr.bf16.mxu0 %v2260_v8 }
 0xe2d   :  { %744 = vmatpush1.bf16.msra.mxu0 %v2265_v9 }
 0xe2e   :  { %745 = vmatprep.subr.bf16.mxu0 %v2269_v10 }
 0xe31   :  { %746 = vmatpush1.bf16.msra.mxu0 %v2272_v11 }
 0xe32   :  { %1753 = vmatprep.subr.bf16.mxu0 %v2126_v0 }
 0xef7   :  { %v685_v37 = vpop.f32.mrb[12].mxu0 }
 0xef8   :  { %v686_v40 = vadd.f32 %v685_v37, %v608_v18  ;;  %v1743_v41 = vpop.f32.mrb[13].mxu0 }
 0xef9   :  { %v688_v42 = vpop.f32.mrb[14].mxu0 }
 0xefa   :  { %v691_v43 = vadd.f32 %v2314_v45, %v686_v40  ;;  %v1744_v44 = vpop.f32.mrb[15].mxu0 }
 0xefc   :  { %1858 = vtanh.f32 %v691_v43  ;;  %v1668_v47 = vmul.f32 -1.442695, %v691_v43 }
 0xefe   :  { %1860 = vpow2.f32 %v1668_v47 }
 0xf06   :  { %v1859_v46 = vpop.eup %1858 }
 0xf07   :  { %701 = vrot.lane.b32.xlu0 %v1859_v46, %s2129_s12 }
 0xf08   :  { %v1861_v48 = vpop.eup %1860 }
 0xf09   :  { %v695_v49 = vadd.f32 1.0, %v1861_v48 }
 0xf0b   :  { %1862 = vrcp.f32 %v695_v49 }
 0xf15   :  { %v1863_v50 = vpop.eup %1862 }
 0xf16   :  { %v699_v53 = vmul.f32 %v1863_v50, %v2360_v61 }
 0xf79   :  { %v702_v51 = vpop.permute.xlu0 %701 }
 0xf7a   :  { %v704_v52 = vmul.f32 %v1863_v50, %v702_v51 }
 0xf7c   :  { %706 = vrot.lane.b32.xlu1 %v704_v52, %s2129_s12 }
 0xf80   :  { %723 = vrot.lane.b32.xlu1 %v643_v34, %s2120_s17 }
 0xf84   :  { %731 = vrot.lane.b32.xlu1 %v637_v31, %s2130_s4 }
 0xfee   :  { %v707_v54 = vpop.permute.xlu1 %706 }
 0xfef   :  { %v709_v55 = vadd.f32 %v707_v54, %v699_v53 }
 0xff1   :  { %1864 = vtanh.f32 %v709_v55 }
 0xff2   :  { %v724_v56 = vpop.permute.xlu1 %723 }
 0xff6   :  { %v732_v57 = vpop.permute.xlu1 %731 }
 0xff7   :  { %v2398_v58 = vsel %vm310_vm3, %v732_v57, %v709_v55 }
 0xff8   :  { %791 = vrot.lane.b32.xlu1 %v2398_v58, %s2129_s12 }
 0xffb   :  { %v1865_v59 = vpop.eup %1864 }
 0xffc   :  { %712 = vrot.lane.b32.xlu0 %v1865_v59, %s2129_s12 }
0x106a   :  { %v792_v26 = vpop.permute.xlu1 %791 }
0x106e   :  { %v713_v60 = vpop.permute.xlu0 %712 }
0x106f   :  { %v2403_v62 = vmul.f32 %v1863_v50, %v713_v60 }
0x1071   :  { %726 = vrot.lane.b32.xlu0 %v2403_v62, %s2130_s4 }
0x10e3   :  { %v727_v61 = vpop.permute.xlu0 %726 }
0x10e4   :  { %v729_v63 = vsel %vm310_vm3, %v724_v56, %v727_v61 }
0x10e5   :  { %v735_v5 = vpack.c.bf16 %v729_v63, %v729_v63 }
0x10e7   :  { %1669 = vmatmul.mubr.msk.bf16.vlgmr.msra.gmra.mrb[16].mxu0 %vm219_vm2, %v735_v5 }
0x10e8   :  { %1754 = vmatpush3.bf16.msra.mxu0 %v2286_v38  ;;  %1757 = vmatprep.mubr.msk.bf16.mxu0 %vm2127_vm0, %v2126_v0 }
0x10e9   :  { %1755 = vmatprep.subr.bf16.mxu0 %v2126_v0 }
0x10ec   :  { %1756 = vmatpush3.bf16.msra.mxu0 %v2289_v39 }
0x10ed   :  { %1073 = vmatprep.subr.bf16.mxu0 %v2249_v3 }
0x11ba   :  { %v773_v12 = vpop.f32.mrb[16].mxu0 }
0x11bb   :  { %v782_v15 = vadd.f32 %v781_v13, %v773_v12  ;;  %v775_v16 = vpop.f32.mrb[17].mxu0  ;;  %v948_v12 = vld [vmem:[#allocation2 + $0x8] sm:$0x3] }
0x11bc   :  { %v777_v17 = vpop.f32.mrb[18].mxu0 }
0x11bd   :  { %1866 = vtanh.f32 %v782_v15  ;;  %v778_v18 = vpop.f32.mrb[19].mxu0  ;;  %v1670_v20 = vmul.f32 -1.442695, %v782_v15 }
0x11bf   :  { %1868 = vpow2.f32 %v1670_v20 }
0x11c7   :  { %v1867_v19 = vpop.eup %1866 }
0x11c8   :  { %796 = vrot.lane.b32.xlu0 %v1867_v19, %s2129_s12 }
0x11c9   :  { %v1869_v21 = vpop.eup %1868 }
0x11ca   :  { %v786_v22 = vadd.f32 1.0, %v1869_v21 }
0x11cc   :  { %1870 = vrcp.f32 %v786_v22 }
0x11d6   :  { %v1871_v23 = vpop.eup %1870 }
0x11d7   :  { %v794_v27 = vmul.f32 %v1871_v23, %v792_v26 }
0x123a   :  { %v797_v24 = vpop.permute.xlu0 %796 }
0x123b   :  { %v799_v25 = vmul.f32 %v1871_v23, %v797_v24 }
0x123d   :  { %801 = vrot.lane.b32.xlu0 %v799_v25, %s2129_s12 }
0x12af   :  { %v802_v28 = vpop.permute.xlu0 %801 }
0x12b0   :  { %v804_v29 = vadd.f32 %v802_v28, %v794_v27 }
0x12b2   :  { %1872 = vtanh.f32 %v804_v29 }
0x12bc   :  { %v1873_v30 = vpop.eup %1872 }
0x12bd   :  { %807 = vrot.lane.b32.xlu1 %v1873_v30, %s2129_s12 }
0x132f   :  { %v808_v31 = vpop.permute.xlu1 %807 }
0x1330   :  { %v810_v32 = vmul.f32 %v1871_v23, %v808_v31 }
0x1332   :  { %v811_v33 = vpack.c.bf16 %v810_v32, %v810_v32 }
0x1334   :  { %813 = vrot.lane.b32.xlu0 %v811_v33, %s2120_s17 }
0x13a6   :  { %v814_v34 = vpop.permute.xlu0 %813 }
0x13a7   :  { %1750 = vmatmul.mubr.msk.bf16.vlgmr.msra.gmra.mrb[12].mxu1 %vm310_vm3, %v814_v34 }
0x13a8   :  { %907 = vmatpush1.bf16.msra.mxu1 %v2251_v4  ;;  %938 = vmatprep.mubr.bf16.mxu1 %v2128_v1 }
0x13a9   :  { %908 = vmatprep.subr.bf16.mxu1 %v2256_v6 }
0x13ac   :  { %909 = vmatpush1.bf16.msra.mxu1 %v2258_v7 }
0x13ad   :  { %910 = vmatprep.subr.bf16.mxu1 %v2260_v8 }
0x13b0   :  { %911 = vmatpush1.bf16.msra.mxu1 %v2265_v9 }
0x13b1   :  { %912 = vmatprep.subr.bf16.mxu1 %v2269_v10 }
0x13b4   :  { %913 = vmatpush1.bf16.msra.mxu1 %v2272_v11 }
0x13b5   :  { %1761 = vmatprep.subr.bf16.mxu1 %v2126_v0 }
0x147a   :  { %v852_v35 = vpop.f32.mrb[12].mxu1 }
0x147b   :  { %v853_v36 = vadd.f32 %v852_v35, %v775_v16  ;;  %v1751_v37 = vpop.f32.mrb[13].mxu1 }
0x147c   :  { %v855_v40 = vpop.f32.mrb[14].mxu1 }
0x147d   :  { %v858_v41 = vadd.f32 %v2314_v45, %v853_v36  ;;  %v1752_v42 = vpop.f32.mrb[15].mxu1 }
0x147f   :  { %1874 = vtanh.f32 %v858_v41  ;;  %v1672_v44 = vmul.f32 -1.442695, %v858_v41 }
0x1481   :  { %1876 = vpow2.f32 %v1672_v44 }
0x1489   :  { %v1875_v43 = vpop.eup %1874 }
0x148a   :  { %868 = vrot.lane.b32.xlu1 %v1875_v43, %s2129_s12 }
0x148b   :  { %v1877_v46 = vpop.eup %1876 }
0x148c   :  { %v862_v47 = vadd.f32 1.0, %v1877_v46 }
0x148e   :  { %1878 = vrcp.f32 %v862_v47 }
0x1498   :  { %v1879_v48 = vpop.eup %1878 }
0x1499   :  { %v866_v51 = vmul.f32 %v1879_v48, %v2398_v58 }
0x14fc   :  { %v869_v49 = vpop.permute.xlu1 %868 }
0x14fd   :  { %v871_v50 = vmul.f32 %v1879_v48, %v869_v49 }
0x14ff   :  { %873 = vrot.lane.b32.xlu0 %v871_v50, %s2129_s12 }
0x1503   :  { %890 = vrot.lane.b32.xlu0 %v810_v32, %s2120_s17 }
0x1507   :  { %898 = vrot.lane.b32.xlu0 %v804_v29, %s2130_s4 }
0x1571   :  { %v874_v52 = vpop.permute.xlu0 %873 }
0x1572   :  { %v876_v53 = vadd.f32 %v874_v52, %v866_v51 }
0x1574   :  { %1880 = vtanh.f32 %v876_v53 }
0x1575   :  { %v891_v54 = vpop.permute.xlu0 %890 }
0x1579   :  { %v899_v55 = vpop.permute.xlu0 %898 }
0x157a   :  { %v2436_v56 = vsel %vm310_vm3, %v899_v55, %v876_v53 }
0x157b   :  { %958 = vrot.lane.b32.xlu0 %v2436_v56, %s2129_s12 }
0x157e   :  { %v1881_v57 = vpop.eup %1880 }
0x157f   :  { %879 = vrot.lane.b32.xlu1 %v1881_v57, %s2129_s12 }
0x15ed   :  { %v959_v25 = vpop.permute.xlu0 %958 }
0x15f1   :  { %v880_v59 = vpop.permute.xlu1 %879 }
0x15f2   :  { %v2441_v60 = vmul.f32 %v1879_v48, %v880_v59 }
0x15f4   :  { %893 = vrot.lane.b32.xlu1 %v2441_v60, %s2130_s4 }
0x1666   :  { %v894_v58 = vpop.permute.xlu1 %893 }
0x1667   :  { %v896_v61 = vsel %vm310_vm3, %v891_v54, %v894_v58 }
0x1668   :  { %v902_v63 = vpack.c.bf16 %v896_v61, %v896_v61 }
0x166a   :  { %1673 = vmatmul.mubr.msk.bf16.vlgmr.msra.gmra.mrb[16].mxu1 %vm219_vm2, %v902_v63 }
0x166b   :  { %1762 = vmatpush3.bf16.msra.mxu1 %v2286_v38  ;;  %1765 = vmatprep.mubr.msk.bf16.mxu1 %vm2127_vm0, %v2126_v0 }
0x166c   :  { %1763 = vmatprep.subr.bf16.mxu1 %v2126_v0 }
0x166f   :  { %1764 = vmatpush3.bf16.msra.mxu1 %v2289_v39 }
0x1670   :  { %1240 = vmatprep.subr.bf16.mxu1 %v2249_v3 }
0x173d   :  { %v940_v5 = vpop.f32.mrb[16].mxu1 }
0x173e   :  { %v949_v13 = vadd.f32 %v948_v12, %v940_v5  ;;  %v942_v15 = vpop.f32.mrb[17].mxu1  ;;  %v1115_v12 = vld [vmem:[#allocation2 + $0xa] sm:$0x3] }
0x173f   :  { %v944_v16 = vpop.f32.mrb[18].mxu1 }
0x1740   :  { %1882 = vtanh.f32 %v949_v13  ;;  %v945_v17 = vpop.f32.mrb[19].mxu1  ;;  %v1674_v19 = vmul.f32 -1.442695, %v949_v13 }
0x1742   :  { %1884 = vpow2.f32 %v1674_v19 }
0x174a   :  { %v1883_v18 = vpop.eup %1882 }
0x174b   :  { %963 = vrot.lane.b32.xlu1 %v1883_v18, %s2129_s12 }
0x174c   :  { %v1885_v20 = vpop.eup %1884 }
0x174d   :  { %v953_v21 = vadd.f32 1.0, %v1885_v20 }
0x174f   :  { %1886 = vrcp.f32 %v953_v21 }
0x1759   :  { %v1887_v22 = vpop.eup %1886 }
0x175a   :  { %v961_v26 = vmul.f32 %v1887_v22, %v959_v25 }
0x17bd   :  { %v964_v23 = vpop.permute.xlu1 %963 }
0x17be   :  { %v966_v24 = vmul.f32 %v1887_v22, %v964_v23 }
0x17c0   :  { %968 = vrot.lane.b32.xlu1 %v966_v24, %s2129_s12 }
0x1832   :  { %v969_v27 = vpop.permute.xlu1 %968 }
0x1833   :  { %v971_v28 = vadd.f32 %v969_v27, %v961_v26 }
0x1835   :  { %1888 = vtanh.f32 %v971_v28 }
0x183f   :  { %v1889_v29 = vpop.eup %1888 }
0x1840   :  { %974 = vrot.lane.b32.xlu0 %v1889_v29, %s2129_s12 }
0x18b2   :  { %v975_v30 = vpop.permute.xlu0 %974 }
0x18b3   :  { %v977_v31 = vmul.f32 %v1887_v22, %v975_v30 }
0x18b5   :  { %v978_v32 = vpack.c.bf16 %v977_v31, %v977_v31 }
0x18b7   :  { %980 = vrot.lane.b32.xlu1 %v978_v32, %s2120_s17 }
0x1929   :  { %v981_v33 = vpop.permute.xlu1 %980 }
0x192a   :  { %1758 = vmatmul.mubr.msk.bf16.vlgmr.msra.gmra.mrb[20].mxu0 %vm310_vm3, %v981_v33 }
0x192b   :  { %1074 = vmatpush1.bf16.msra.mxu0 %v2251_v4  ;;  %1105 = vmatprep.mubr.bf16.mxu0 %v2128_v1 }
0x192c   :  { %1075 = vmatprep.subr.bf16.mxu0 %v2256_v6 }
0x192f   :  { %1076 = vmatpush1.bf16.msra.mxu0 %v2258_v7 }
0x1930   :  { %1077 = vmatprep.subr.bf16.mxu0 %v2260_v8 }
0x1933   :  { %1078 = vmatpush1.bf16.msra.mxu0 %v2265_v9 }
0x1934   :  { %1079 = vmatprep.subr.bf16.mxu0 %v2269_v10 }
0x1937   :  { %1080 = vmatpush1.bf16.msra.mxu0 %v2272_v11 }
0x1938   :  { %1769 = vmatprep.subr.bf16.mxu0 %v2126_v0 }
0x19fd   :  { %v1019_v34 = vpop.f32.mrb[20].mxu0 }
0x19fe   :  { %v1020_v35 = vadd.f32 %v1019_v34, %v942_v15  ;;  %v1759_v36 = vpop.f32.mrb[21].mxu0 }
0x19ff   :  { %v1022_v37 = vpop.f32.mrb[22].mxu0 }
0x1a00   :  { %v1025_v40 = vadd.f32 %v2314_v45, %v1020_v35  ;;  %v1760_v41 = vpop.f32.mrb[23].mxu0 }
0x1a02   :  { %1890 = vtanh.f32 %v1025_v40  ;;  %v1676_v43 = vmul.f32 -1.442695, %v1025_v40 }
0x1a04   :  { %1892 = vpow2.f32 %v1676_v43 }
0x1a0c   :  { %v1891_v42 = vpop.eup %1890 }
0x1a0d   :  { %1035 = vrot.lane.b32.xlu0 %v1891_v42, %s2129_s12 }
0x1a0e   :  { %v1893_v44 = vpop.eup %1892 }
0x1a0f   :  { %v1029_v46 = vadd.f32 1.0, %v1893_v44 }
0x1a11   :  { %1894 = vrcp.f32 %v1029_v46 }
0x1a1b   :  { %v1895_v47 = vpop.eup %1894 }
0x1a1c   :  { %v1033_v50 = vmul.f32 %v1895_v47, %v2436_v56 }
0x1a7f   :  { %v1036_v48 = vpop.permute.xlu0 %1035 }
0x1a80   :  { %v1038_v49 = vmul.f32 %v1895_v47, %v1036_v48 }
0x1a82   :  { %1040 = vrot.lane.b32.xlu1 %v1038_v49, %s2129_s12 }
0x1a86   :  { %1057 = vrot.lane.b32.xlu1 %v977_v31, %s2120_s17 }
0x1a8a   :  { %1065 = vrot.lane.b32.xlu1 %v971_v28, %s2130_s4 }
0x1af4   :  { %v1041_v51 = vpop.permute.xlu1 %1040 }
0x1af5   :  { %v1043_v52 = vadd.f32 %v1041_v51, %v1033_v50 }
0x1af7   :  { %1896 = vtanh.f32 %v1043_v52 }
0x1af8   :  { %v1058_v53 = vpop.permute.xlu1 %1057 }
0x1afc   :  { %v1066_v54 = vpop.permute.xlu1 %1065 }
0x1afd   :  { %v2474_v55 = vsel %vm310_vm3, %v1066_v54, %v1043_v52 }
0x1afe   :  { %1125 = vrot.lane.b32.xlu1 %v2474_v55, %s2129_s12 }
0x1b01   :  { %v1897_v57 = vpop.eup %1896 }
0x1b02   :  { %1046 = vrot.lane.b32.xlu0 %v1897_v57, %s2129_s12 }
0x1b74   :  { %v1047_v59 = vpop.permute.xlu0 %1046 }
0x1b75   :  { %v2479_v58 = vmul.f32 %v1895_v47, %v1047_v59 }
0x1b77   :  { %1060 = vrot.lane.b32.xlu0 %v2479_v58, %s2130_s4 }
0x1be9   :  { %v1061_v56 = vpop.permute.xlu0 %1060 }
0x1bea   :  { %v1063_v61 = vsel %vm310_vm3, %v1058_v53, %v1061_v56 }
0x1beb   :  { %v1069_v63 = vpack.c.bf16 %v1063_v61, %v1063_v61 }
0x1bed   :  { %1677 = vmatmul.mubr.msk.bf16.vlgmr.msra.gmra.mrb[24].mxu0 %vm219_vm2, %v1069_v63 }
0x1bee   :  { %1770 = vmatpush3.bf16.msra.mxu0 %v2286_v38  ;;  %1773 = vmatprep.mubr.msk.bf16.mxu0 %vm2127_vm0, %v2126_v0 }
0x1bef   :  { %1771 = vmatprep.subr.bf16.mxu0 %v2126_v0 }
0x1bf2   :  { %1772 = vmatpush3.bf16.msra.mxu0 %v2289_v39 }
0x1bf3   :  { %1407 = vmatprep.subr.bf16.mxu0 %v2249_v3  ;;  %v1126_v3 = vpop.permute.xlu1 %1125 }
0x1cc0   :  { %v1107_v5 = vpop.f32.mrb[24].mxu0 }
0x1cc1   :  { %v1116_v13 = vadd.f32 %v1115_v12, %v1107_v5  ;;  %v1109_v15 = vpop.f32.mrb[25].mxu0 }
0x1cc2   :  { %v1111_v16 = vpop.f32.mrb[26].mxu0 }
0x1cc3   :  { %1898 = vtanh.f32 %v1116_v13  ;;  %v1112_v17 = vpop.f32.mrb[27].mxu0  ;;  %v1678_v19 = vmul.f32 -1.442695, %v1116_v13 }
0x1cc5   :  { %1900 = vpow2.f32 %v1678_v19 }
0x1ccd   :  { %v1899_v18 = vpop.eup %1898 }
0x1cce   :  { %1130 = vrot.lane.b32.xlu0 %v1899_v18, %s2129_s12 }
0x1ccf   :  { %v1901_v20 = vpop.eup %1900 }
0x1cd0   :  { %v1120_v21 = vadd.f32 1.0, %v1901_v20 }
0x1cd2   :  { %1902 = vrcp.f32 %v1120_v21 }
0x1cdc   :  { %v1903_v22 = vpop.eup %1902 }
0x1cdd   :  { %v1128_v25 = vmul.f32 %v1903_v22, %v1126_v3  ;;  %v1947_v3 = vld [vmem:[#allocation9 + $0x14] ss:$8 sps:$4 sm:$0xff]  }
0x1d40   :  { %v1131_v23 = vpop.permute.xlu0 %1130 }
0x1d41   :  { %v1133_v24 = vmul.f32 %v1903_v22, %v1131_v23 }
0x1d43   :  { %1135 = vrot.lane.b32.xlu0 %v1133_v24, %s2129_s12  ;;  %v1946_v24 = vld [vmem:[#allocation9] ss:$8 sps:$4 sm:$0xff]  }
0x1db5   :  { %v1136_v26 = vpop.permute.xlu0 %1135 }
0x1db6   :  { %v1138_v27 = vadd.f32 %v1136_v26, %v1128_v25  ;;  %v1948_v25 = vld [vmem:[#allocation9 + $0x10] ss:$8 sps:$4 sm:$0xff]   ;;  %v1949_v26 = vld [vmem:[#allocation9 + $0x24] ss:$8 sps:$4 sm:$0xff]  }
0x1db8   :  { %1904 = vtanh.f32 %v1138_v27 }
0x1dc2   :  { %v1905_v28 = vpop.eup %1904 }
0x1dc3   :  { %1141 = vrot.lane.b32.xlu1 %v1905_v28, %s2129_s12  ;;  %v1951_v28 = vld [vmem:[#allocation9 + $0x34] ss:$8 sps:$4 sm:$0xff]  }
0x1e35   :  { %v1142_v29 = vpop.permute.xlu1 %1141 }
0x1e36   :  { %v1144_v30 = vmul.f32 %v1903_v22, %v1142_v29  ;;  %v1952_v29 = vld [vmem:[#allocation9 + $0x30] ss:$8 sps:$4 sm:$0xff]  }
0x1e38   :  { %v1145_v31 = vpack.c.bf16 %v1144_v30, %v1144_v30 }
0x1e3a   :  { %1147 = vrot.lane.b32.xlu0 %v1145_v31, %s2120_s17 }
0x1eac   :  { %v1148_v32 = vpop.permute.xlu0 %1147 }
0x1ead   :  { %1766 = vmatmul.mubr.msk.bf16.vlgmr.msra.gmra.mrb[20].mxu1 %vm310_vm3, %v1148_v32 }
0x1eae   :  { %1241 = vmatpush1.bf16.msra.mxu1 %v2251_v4  ;;  %1272 = vmatprep.mubr.bf16.mxu1 %v2128_v1 }
0x1eaf   :  { %1242 = vmatprep.subr.bf16.mxu1 %v2256_v6 }
0x1eb2   :  { %1243 = vmatpush1.bf16.msra.mxu1 %v2258_v7 }
0x1eb3   :  { %1244 = vmatprep.subr.bf16.mxu1 %v2260_v8 }
0x1eb6   :  { %1245 = vmatpush1.bf16.msra.mxu1 %v2265_v9 }
0x1eb7   :  { %1246 = vmatprep.subr.bf16.mxu1 %v2269_v10 }
0x1eba   :  { %1247 = vmatpush1.bf16.msra.mxu1 %v2272_v11 }
0x1ebb   :  { %1777 = vmatprep.subr.bf16.mxu1 %v2126_v0 }
0x1f80   :  { %v1186_v33 = vpop.f32.mrb[20].mxu1 }
0x1f81   :  { %v1187_v34 = vadd.f32 %v1186_v33, %v1109_v15  ;;  %v1767_v35 = vpop.f32.mrb[21].mxu1 }
0x1f82   :  { %v1189_v4 = vpop.f32.mrb[22].mxu1 }
0x1f83   :  { %v1192_v36 = vadd.f32 %v2314_v45, %v1187_v34  ;;  %v1768_v37 = vpop.f32.mrb[23].mxu1 }
0x1f85   :  { %1906 = vtanh.f32 %v1192_v36  ;;  %v1680_v7 = vmul.f32 -1.442695, %v1192_v36 }
0x1f87   :  { %1908 = vpow2.f32 %v1680_v7 }
0x1f8f   :  { %v1907_v6 = vpop.eup %1906 }
0x1f90   :  { %1202 = vrot.lane.b32.xlu1 %v1907_v6, %s2129_s12 }
0x1f91   :  { %v1909_v8 = vpop.eup %1908 }
0x1f92   :  { %v1196_v9 = vadd.f32 1.0, %v1909_v8 }
0x1f94   :  { %1910 = vrcp.f32 %v1196_v9 }
0x1f9e   :  { %v1911_v10 = vpop.eup %1910 }
0x1f9f   :  { %v1200_v41 = vmul.f32 %v1911_v10, %v2474_v55  ;;  %v1282_v55 = vld [vmem:[#allocation2 + $0xc] sm:$0x3] }
0x2002   :  { %v1203_v11 = vpop.permute.xlu1 %1202 }
0x2003   :  { %v1205_v40 = vmul.f32 %v1911_v10, %v1203_v11 }
0x2005   :  { %1207 = vrot.lane.b32.xlu0 %v1205_v40, %s2129_s12 }
0x2009   :  { %1224 = vrot.lane.b32.xlu0 %v1144_v30, %s2120_s17 }
0x200d   :  { %1232 = vrot.lane.b32.xlu0 %v1138_v27, %s2130_s4  ;;  %v1950_v27 = vld [vmem:[#allocation9 + $0x20] ss:$8 sps:$4 sm:$0xff]  }
0x2077   :  { %v1208_v42 = vpop.permute.xlu0 %1207 }
0x2078   :  { %v1210_v43 = vadd.f32 %v1208_v42, %v1200_v41 }
0x207a   :  { %1912 = vtanh.f32 %v1210_v43 }
0x207b   :  { %v1225_v44 = vpop.permute.xlu0 %1224 }
0x207f   :  { %v1233_v46 = vpop.permute.xlu0 %1232 }
0x2080   :  { %v2512_v47 = vsel %vm310_vm3, %v1233_v46, %v1210_v43 }
0x2081   :  { %1292 = vrot.lane.b32.xlu0 %v2512_v47, %s2129_s12 }
0x2084   :  { %v1913_v48 = vpop.eup %1912 }
0x2085   :  { %1213 = vrot.lane.b32.xlu1 %v1913_v48, %s2129_s12 }
0x20f7   :  { %v1214_v49 = vpop.permute.xlu1 %1213 }
0x20f8   :  { %v2517_v50 = vmul.f32 %v1911_v10, %v1214_v49 }
0x20fa   :  { %1227 = vrot.lane.b32.xlu1 %v2517_v50, %s2130_s4 }
0x216c   :  { %v1228_v51 = vpop.permute.xlu1 %1227 }
0x216d   :  { %v1230_v52 = vsel %vm310_vm3, %v1225_v44, %v1228_v51  ;;  %v1449_v51 = vld [vmem:[#allocation2 + $0xe] sm:$0x3] }
0x216e   :  { %v1236_v53 = vpack.c.bf16 %v1230_v52, %v1230_v52 }
0x2170   :  { %1681 = vmatmul.mubr.msk.bf16.vlgmr.msra.gmra.mrb[24].mxu1 %vm219_vm2, %v1236_v53 }
0x2171   :  { %1778 = vmatpush3.bf16.msra.mxu1 %v2286_v38  ;;  %1781 = vmatprep.mubr.msk.bf16.mxu1 %vm2127_vm0, %v2126_v0 }
0x2172   :  { %1779 = vmatprep.subr.bf16.mxu1 %v2126_v0 }
0x2175   :  { %1780 = vmatpush3.bf16.msra.mxu1 %v2289_v39  ;;  %v1293_v39 = vpop.permute.xlu0 %1292 }
0x2243   :  { %v1274_v54 = vpop.f32.mrb[24].mxu1 }
0x2244   :  { %v1283_v57 = vadd.f32 %v1282_v55, %v1274_v54  ;;  %v1276_v59 = vpop.f32.mrb[25].mxu1 }
0x2245   :  { %v1278_v56 = vpop.f32.mrb[26].mxu1 }
0x2246   :  { %1914 = vtanh.f32 %v1283_v57  ;;  %v1279_v61 = vpop.f32.mrb[27].mxu1  ;;  %v1682_v5 = vmul.f32 -1.442695, %v1283_v57 }
0x2248   :  { %1916 = vpow2.f32 %v1682_v5 }
0x2250   :  { %v1915_v63 = vpop.eup %1914 }
0x2251   :  { %1297 = vrot.lane.b32.xlu1 %v1915_v63, %s2129_s12 }
0x2252   :  { %v1917_v38 = vpop.eup %1916 }
0x2253   :  { %v1287_v12 = vadd.f32 1.0, %v1917_v38 }
0x2255   :  { %1918 = vrcp.f32 %v1287_v12 }
0x225f   :  { %v1919_v13 = vpop.eup %1918 }
0x2260   :  { %v1295_v16 = vmul.f32 %v1919_v13, %v1293_v39 }
0x22c3   :  { %v1298_v15 = vpop.permute.xlu1 %1297 }
0x22c4   :  { %v1300_v0 = vmul.f32 %v1919_v13, %v1298_v15 }
0x22c6   :  { %1302 = vrot.lane.b32.xlu1 %v1300_v0, %s2129_s12 }
0x2338   :  { %v1303_v17 = vpop.permute.xlu1 %1302 }
0x2339   :  { %v1305_v18 = vadd.f32 %v1303_v17, %v1295_v16 }
0x233b   :  { %1920 = vtanh.f32 %v1305_v18 }
0x2345   :  { %v1921_v19 = vpop.eup %1920 }
0x2346   :  { %1308 = vrot.lane.b32.xlu0 %v1921_v19, %s2129_s12 }
0x23b8   :  { %v1309_v20 = vpop.permute.xlu0 %1308 }
0x23b9   :  { %v1311_v21 = vmul.f32 %v1919_v13, %v1309_v20 }
0x23bb   :  { %v1312_v22 = vpack.c.bf16 %v1311_v21, %v1311_v21 }
0x23bd   :  { %1314 = vrot.lane.b32.xlu1 %v1312_v22, %s2120_s17 }
0x242f   :  { %v1315_v23 = vpop.permute.xlu1 %1314 }
0x2430   :  { %1774 = vmatmul.mubr.msk.bf16.vlgmr.msra.gmra.mrb[28].mxu0 %vm310_vm3, %v1315_v23 }
0x2431   :  { %1408 = vmatpush1.bf16.msra.mxu0 %v1946_v24  ;;  %1439 = vmatprep.mubr.bf16.mxu0 %v2128_v1  ;;  %v1953_v24 = vld [vmem:[%s2646_s5] ss:$0 sm:$0xff]  ;;  %s2131_s5 = smov [#allocation12]  }
0x2432   :  { %1409 = vmatprep.subr.bf16.mxu0 %v1947_v3 }
0x2435   :  { %1410 = vmatpush1.bf16.msra.mxu0 %v1948_v25 }
0x2436   :  { %1411 = vmatprep.subr.bf16.mxu0 %v1949_v26 }
0x2439   :  { %1412 = vmatpush1.bf16.msra.mxu0 %v1950_v27 }
0x243a   :  { %1413 = vmatprep.subr.bf16.mxu0 %v1951_v28 }
0x243d   :  { %1414 = vmatpush1.bf16.msra.mxu0 %v1952_v29 }
0x2503   :  { %v1353_v30 = vpop.f32.mrb[28].mxu0 }
0x2504   :  { %v1354_v31 = vadd.f32 %v1353_v30, %v1276_v59  ;;  %v1775_v32 = vpop.f32.mrb[29].mxu0 }
0x2505   :  { %v1356_v33 = vpop.f32.mrb[30].mxu0 }
0x2506   :  { %v1359_v34 = vadd.f32 %v2314_v45, %v1354_v31  ;;  %v1776_v35 = vpop.f32.mrb[31].mxu0 }
0x2508   :  { %1922 = vtanh.f32 %v1359_v34  ;;  %v1684_v4 = vmul.f32 -1.442695, %v1359_v34 }
0x250a   :  { %1924 = vpow2.f32 %v1684_v4 }
0x2512   :  { %v1923_v1 = vpop.eup %1922 }
0x2513   :  { %1369 = vrot.lane.b32.xlu0 %v1923_v1, %s2129_s12 }
0x2514   :  { %v1925_v36 = vpop.eup %1924 }
0x2515   :  { %v1363_v37 = vadd.f32 1.0, %v1925_v36 }
0x2517   :  { %1926 = vrcp.f32 %v1363_v37 }
0x2521   :  { %v1927_v6 = vpop.eup %1926 }
0x2522   :  { %v1367_v45 = vmul.f32 %v1927_v6, %v2512_v47 }
0x2585   :  { %v1370_v7 = vpop.permute.xlu0 %1369 }
0x2586   :  { %v1372_v8 = vmul.f32 %v1927_v6, %v1370_v7 }
0x2588   :  { %1374 = vrot.lane.b32.xlu1 %v1372_v8, %s2129_s12 }
0x258c   :  { %1391 = vrot.lane.b32.xlu1 %v1311_v21, %s2120_s17 }
0x2590   :  { %1399 = vrot.lane.b32.xlu1 %v1305_v18, %s2130_s4 }
0x25fa   :  { %v1375_v9 = vpop.permute.xlu1 %1374 }
0x25fb   :  { %v1377_v10 = vadd.f32 %v1375_v9, %v1367_v45 }
0x25fd   :  { %1928 = vtanh.f32 %v1377_v10 }
0x25fe   :  { %v1392_v11 = vpop.permute.xlu1 %1391 }
0x2602   :  { %v1400_v40 = vpop.permute.xlu1 %1399 }
0x2603   :  { %v2541_v41 = vsel %vm310_vm3, %v1400_v40, %v1377_v10 }
0x2604   :  { %1459 = vrot.lane.b32.xlu1 %v2541_v41, %s2129_s12 }
0x2607   :  { %v1929_v42 = vpop.eup %1928 }
0x2608   :  { %1380 = vrot.lane.b32.xlu0 %v1929_v42, %s2129_s12 }
0x2676   :  { %v1460_v12 = vpop.permute.xlu1 %1459 }
0x267a   :  { %v1381_v43 = vpop.permute.xlu0 %1380 }
0x267b   :  { %v1383_v44 = vmul.f32 %v1927_v6, %v1381_v43 }
0x267d   :  { %1394 = vrot.lane.b32.xlu0 %v1383_v44, %s2130_s4 }
0x26ef   :  { %v1395_v46 = vpop.permute.xlu0 %1394 }
0x26f0   :  { %v1397_v47 = vsel %vm310_vm3, %v1392_v11, %v1395_v46 }
0x26f1   :  { %v1403_v48 = vpack.c.bf16 %v1397_v47, %v1397_v47 }
0x26f3   :  { %1685 = vmatmul.mubr.msk.bf16.vlgmr.msra.gmra.mrb[32].mxu0 %vm219_vm2, %v1403_v48 }
0x27c6   :  { %v1441_v49 = vpop.f32.mrb[32].mxu0 }
0x27c7   :  { %v1450_v52 = vadd.f32 %v1449_v51, %v1441_v49  ;;  %v1443_v53 = vpop.f32.mrb[33].mxu0 }
0x27c8   :  { %v1445_v54 = vpop.f32.mrb[34].mxu0 }
0x27c9   :  { %1930 = vtanh.f32 %v1450_v52  ;;  %v1446_v55 = vpop.f32.mrb[35].mxu0  ;;  %v1686_v59 = vmul.f32 -1.442695, %v1450_v52 }
0x27cb   :  { %1932 = vpow2.f32 %v1686_v59 }
0x27d3   :  { %v1931_v57 = vpop.eup %1930 }
0x27d4   :  { %1464 = vrot.lane.b32.xlu0 %v1931_v57, %s2129_s12 }
0x27d5   :  { %v1933_v56 = vpop.eup %1932 }
0x27d6   :  { %v1454_v61 = vadd.f32 1.0, %v1933_v56 }
0x27d8   :  { %1934 = vrcp.f32 %v1454_v61 }
0x27e2   :  { %v1935_v63 = vpop.eup %1934 }
0x27e3   :  { %v1462_v13 = vmul.f32 %v1935_v63, %v1460_v12 }
0x2846   :  { %v1465_v5 = vpop.permute.xlu0 %1464 }
0x2847   :  { %v1467_v38 = vmul.f32 %v1935_v63, %v1465_v5 }
0x2849   :  { %1469 = vrot.lane.b32.xlu0 %v1467_v38, %s2129_s12 }
0x28bb   :  { %v1470_v15 = vpop.permute.xlu0 %1469 }
0x28bc   :  { %v1472_v0 = vadd.f32 %v1470_v15, %v1462_v13 }
0x28be   :  { %1936 = vtanh.f32 %v1472_v0 }
0x28c8   :  { %v1937_v39 = vpop.eup %1936 }
0x28c9   :  { %1475 = vrot.lane.b32.xlu1 %v1937_v39, %s2129_s12 }
0x293b   :  { %v1476_v16 = vpop.permute.xlu1 %1475 }
0x293c   :  { %v1478_v17 = vmul.f32 %v1935_v63, %v1476_v16 }
0x293e   :  { %v1479_v18 = vpack.c.bf16 %v1478_v17, %v1478_v17 }
0x2940   :  { %1481 = vrot.lane.b32.xlu0 %v1479_v18, %s2120_s17 }
0x29b2   :  { %v1482_v19 = vpop.permute.xlu0 %1481 }
0x29b3   :  { %1782 = vmatmul.mubr.msk.bf16.vlgmr.msra.gmra.mrb[28].mxu1 %vm310_vm3, %v1482_v19 }
0x2a86   :  { %v1520_v20 = vpop.f32.mrb[28].mxu1 }
0x2a87   :  { %v1521_v21 = vadd.f32 %v1520_v20, %v1443_v53  ;;  %v1783_v22 = vpop.f32.mrb[29].mxu1 }
0x2a88   :  { %v1523_v23 = vpop.f32.mrb[30].mxu1 }
0x2a89   :  { %v1526_v3 = vadd.f32 %v1953_v24, %v1521_v21  ;;  %v1784_v25 = vpop.f32.mrb[31].mxu1 }
0x2a8b   :  { %1938 = vtanh.f32 %v1526_v3  ;;  %v1688_v27 = vmul.f32 -1.442695, %v1526_v3 }
0x2a8d   :  { %1940 = vpow2.f32 %v1688_v27 }
0x2a95   :  { %v1939_v26 = vpop.eup %1938 }
0x2a96   :  { %1536 = vrot.lane.b32.xlu1 %v1939_v26, %s2129_s12 }
0x2a97   :  { %v1941_v28 = vpop.eup %1940 }
0x2a98   :  { %v1530_v29 = vadd.f32 1.0, %v1941_v28 }
0x2a9a   :  { %1942 = vrcp.f32 %v1530_v29 }
0x2aa4   :  { %v1943_v30 = vpop.eup %1942 }
0x2aa5   :  { %v1534_v33 = vmul.f32 %v1943_v30, %v2541_v41 }
0x2b08   :  { %v1537_v31 = vpop.permute.xlu1 %1536 }
0x2b09   :  { %v1539_v32 = vmul.f32 %v1943_v30, %v1537_v31 }
0x2b0b   :  { %1541 = vrot.lane.b32.xlu0 %v1539_v32, %s2129_s12 }
0x2b0f   :  { %1558 = vrot.lane.b32.xlu0 %v1478_v17, %s2120_s17 }
0x2b13   :  { %1566 = vrot.lane.b32.xlu0 %v1472_v0, %s2130_s4 }
0x2b17   :  { %383 = vrot.lane.b32.xlu0 %v2327_v14, %s2120_s17 }
0x2b1b   :  { %717 = vrot.lane.b32.xlu0 %v2403_v62, %s2120_s17 }
0x2b1f   :  { %1051 = vrot.lane.b32.xlu0 %v2479_v58, %s2120_s17 }
0x2b23   :  { %1385 = vrot.lane.b32.xlu0 %v1383_v44, %s2120_s17 }
0x2b7d   :  { %v1542_v34 = vpop.permute.xlu0 %1541 }
0x2b7e   :  { %v1544_v35 = vadd.f32 %v1542_v34, %v1534_v33 }
0x2b80   :  { %1944 = vtanh.f32 %v1544_v35 }
0x2b81   :  { %v1559_v1 = vpop.permute.xlu0 %1558 }
0x2b85   :  { %v1567_v4 = vpop.permute.xlu0 %1566 }
0x2b86   :  { %v1569_v36 = vsel %vm310_vm3, %v1567_v4, %v1544_v35 }
0x2b87   :  { %1571 = vrot.lane.b32.xlu0 %v1569_v36, %s2120_s17  ;;  %1586 = vst.msk [vmem:[#allocation15] sm:$0x3] %vm386_vm4, %v1569_v36 }
0x2b89   :  { %v384_v14 = vpop.permute.xlu0 %383 }
0x2b8a   :  { %v1945_v62 = vpop.eup %1944  ;;  %387 = vst.msk [vmem:[#allocation12] sm:$0x3] %vm386_vm4, %v384_v14 }
0x2b8b   :  { %1547 = vrot.lane.b32.xlu1 %v1945_v62, %s2129_s12 }
0x2b8d   :  { %v718_v58 = vpop.permute.xlu0 %717 }
0x2b8e   :  { %721 = vst.msk [vmem:[#allocation12 + $0x4] sm:$0x3] %vm386_vm4, %v718_v58 }
0x2b91   :  { %v1052_v37 = vpop.permute.xlu0 %1051 }
0x2b92   :  { %1055 = vst.msk [vmem:[#allocation12 + $0x8] sm:$0x3] %vm386_vm4, %v1052_v37 }
0x2b95   :  { %v1386_v6 = vpop.permute.xlu0 %1385 }
0x2b96   :  { %1389 = vst.msk [vmem:[#allocation12 + $0xc] sm:$0x3] %vm386_vm4, %v1386_v6 }
0x2bf9   :  { %v1572_v9 = vpop.permute.xlu0 %1571 }
0x2bfd   :  { %v1548_v7 = vpop.permute.xlu1 %1547 }
0x2bfe   :  { %v1550_v8 = vmul.f32 %v1943_v30, %v1548_v7 }
0x2c00   :  { %1561 = vrot.lane.b32.xlu1 %v1550_v8, %s2130_s4 }
0x2c04   :  { %550 = vrot.lane.b32.xlu1 %v2365_v2, %s2120_s17 }
0x2c08   :  { %884 = vrot.lane.b32.xlu1 %v2441_v60, %s2120_s17 }
0x2c0c   :  { %1218 = vrot.lane.b32.xlu1 %v2517_v50, %s2120_s17 }
0x2c10   :  { %1552 = vrot.lane.b32.xlu1 %v1550_v8, %s2120_s17  ;;  %s1597_s17 = sshll.u32 %s2131_s5, 4  ;;  %s1598_s17 = int_to_ptr.vmem [resolvable:$true] %s1597_s17 }
0x2c11   :  { %s2042_s19 = scalar_lea.vmem %s1598_s17, 256  ;;  %p2047_p5 = scmp.lt.s32.totalorder %s1598_s17, %s1598_s17 }
0x2c12   :  { %p2043_p4 = scmp.ne.s32.totalorder %s1598_s17, %s2042_s19  ;;  %p2048_p6 = scmp.lt.s32.totalorder %s2042_s19, %s2042_s19 }
0x2c14   :  { %p2049_p7 = por %p2048_p6, %p2047_p5 }
0x2c16   :  { %p2050_p8 = pnand %p2049_p7, %p2043_p4 }
0x2c72   :  { %v1562_v45 = vpop.permute.xlu1 %1561 }
0x2c73   :  { %v1564_v10 = vsel %vm310_vm3, %v1559_v1, %v1562_v45 }
0x2c74   :  { %1581 = vrot.lane.b32.xlu1 %v1564_v10, %s2130_s4  ;;  %v1574_v11 = vsel %vm219_vm2, %v1564_v10, %v1572_v9  ;;  %1579 = vst.msk [vmem:[#allocation13] sm:$0x3] %vm386_vm4, %v1564_v10 }
0x2c75   :  { %1575 = vst [vmem:[#allocation3] sm:$0x3] %v1574_v11 }
0x2c76   :  { %v551_v2 = vpop.permute.xlu1 %550 }
0x2c77   :  { %554 = vst.msk [vmem:[#allocation12 + $0x2] sm:$0x3] %vm386_vm4, %v551_v2 }
0x2c78   :  { %1587 = vrot.lane.b32.xlu1 %v1569_v36, %s2130_s4 }
0x2c7a   :  { %v885_v60 = vpop.permute.xlu1 %884 }
0x2c7b   :  { %888 = vst.msk [vmem:[#allocation12 + $0x6] sm:$0x3] %vm386_vm4, %v885_v60 }
0x2c7e   :  { %v1219_v50 = vpop.permute.xlu1 %1218 }
0x2c7f   :  { %1222 = vst.msk [vmem:[#allocation12 + $0xa] sm:$0x3] %vm386_vm4, %v1219_v50 }
0x2c82   :  { %v1553_v40 = vpop.permute.xlu1 %1552 }
0x2c83   :  { %1556 = vst.msk [vmem:[#allocation12 + $0xe] sm:$0x3] %vm386_vm4, %v1553_v40 }
0x2c84   :  { %2053 = shalt.err (!%p2050_p8)
}
0x2c85   :  { %s2054_s30 = scalar_lea.hbm %s2647_s6, 256 }
0x2c86   :  { %p2055_p9 = scmp.ne.s32.totalorder %s2647_s6, %s2054_s30  ;;  %p2058_p10 = scmp.lt.u32.totalorder %s2054_s30, %s2647_s6 }
0x2c88   :  { %p2060_p11 = pnand %p2058_p10, %p2055_p9 }
0x2c8a   :  { %2063 = shalt.err (!%p2060_p11)
}
0x2c8b   :  { %s2132_s25 = smov 2   ;;  %s2133_s29 = smov [#allocation13]  }
0x2c8c   :  { %1603 = dma.vmem_to_hbm [thread:$0]  %s1598_s17, 256, %s2647_s6, [#allocation6], %s2129_s12, %s2129_s12, %s2132_s25  }
0x2c8d   :  { %s1609_s1 = sshll.u32 %s2133_s29, 4  ;;  %s2134_s28 = smov [#allocation15]   ;;  %s1610_s1 = int_to_ptr.vmem [resolvable:$true] %s1609_s1 }
0x2c8e   :  { %s1621_s9 = sshll.u32 %s2134_s28, 4  ;;  %s2064_s11 = scalar_lea.vmem %s1610_s1, 64  ;;  %s1622_s9 = int_to_ptr.vmem [resolvable:$true] %s1621_s9 }
0x2c8f   :  { %p2065_p12 = scmp.ne.s32.totalorder %s1610_s1, %s2064_s11  ;;  %p2069_p13 = scmp.lt.s32.totalorder %s1610_s1, %s1610_s1 }
0x2c90   :  { %p2070_p0 = scmp.lt.s32.totalorder %s2064_s11, %s2064_s11 }
0x2c92   :  { %p2071_p1 = por %p2070_p0, %p2069_p13 }
0x2c94   :  { %p2072_p2 = pnand %p2071_p1, %p2065_p12 }
0x2ce6   :  { %v1582_v41 = vpop.permute.xlu1 %1581 }
0x2ce7   :  { %1585 = vst.msk [vmem:[#allocation13 + $0x2] sm:$0x3] %vm386_vm4, %v1582_v41 }
0x2ce8   :  { %2075 = shalt.err (!%p2072_p2)
}
0x2ce9   :  { %s2076_s3 = scalar_lea.hbm %s2648_s7, 64 }
0x2cea   :  { %p2077_p3 = scmp.ne.s32.totalorder %s2648_s7, %s2076_s3  ;;  %p2080_p4 = scmp.lt.u32.totalorder %s2076_s3, %s2648_s7 }
0x2cec   :  { %p2082_p5 = pnand %p2080_p4, %p2077_p3 }
0x2cee   :  { %2085 = shalt.err (!%p2082_p5)
}
0x2cef   :  { %1615 = dma.vmem_to_hbm [thread:$0]  %s1610_s1, 64, %s2648_s7, [#allocation14], %s2129_s12, %s2129_s12, %s2132_s25   ;;  %v1588_v42 = vpop.permute.xlu1 %1587 }
0x2cf0   :  { %1591 = vst.msk [vmem:[#allocation15 + $0x2] sm:$0x3] %vm386_vm4, %v1588_v42  ;;  %s2086_s16 = scalar_lea.vmem %s1622_s9, 64  ;;  %p2091_p7 = scmp.lt.s32.totalorder %s1622_s9, %s1622_s9 }
0x2cf1   :  { %p2087_p6 = scmp.ne.s32.totalorder %s1622_s9, %s2086_s16  ;;  %p2092_p8 = scmp.lt.s32.totalorder %s2086_s16, %s2086_s16 }
0x2cf3   :  { %p2093_p9 = por %p2092_p8, %p2091_p7 }
0x2cf5   :  { %p2094_p10 = pnand %p2093_p9, %p2087_p6 }
0x2cf7   :  { %2097 = shalt.err (!%p2094_p10)
}
0x2cf8   :  { %s2098_s19 = scalar_lea.hbm %s2649_s8, 64 }
0x2cf9   :  { %p2099_p11 = scmp.ne.s32.totalorder %s2649_s8, %s2098_s19  ;;  %p2102_p12 = scmp.lt.u32.totalorder %s2098_s19, %s2649_s8 }
0x2cfb   :  { %p2104_p13 = pnand %p2102_p12, %p2099_p11 }
0x2cfd   :  { %2107 = shalt.err (!%p2104_p13)
}
0x2cfe   :  { %1627 = dma.vmem_to_hbm [thread:$0]  %s1622_s9, 64, %s2649_s8, [#allocation14], %s2129_s12, %s2129_s12, %s2132_s25  }
0x2cff   :  { %2114 = dma.done.wait [#allocation6], 256  }
0x2d00   :  { %2115 = vsyncadd [#allocation6], 4294967040 }
0x2d01   :  { %2116 = dma.done.wait [#allocation14], 128  }
0x2d02   :  { %2117 = vsyncadd [#allocation14], 4294967168 }
0x2d03   :  { %1637 = vsyncpa [#allocation5], 1 }
0x2d04   :  { %1638 = vsyncpa [#allocation8], 1 }
0x2d05   :  { %1639 = vsyncpa [#allocation11], 1 }
0x2d06   :  { %1640 = vsyncpa [#allocation6], 1 }
0x2d07   :  { %1641 = vsyncpa [#allocation14], 1 }

</bundles_post_ra>
